<compile_context>
chip_gen: v6e
topology: v6e:2x2x1
jax: 0.10.0
libtpu: 0.0.40
codegen_flags: <defaults>
</compile_context>

<pallas_src>
import functools

import jax
import jax.numpy as jnp
from jax.experimental import pallas as pl
from jax.experimental.pallas import tpu as pltpu


_GATE_ORDER = (0, 1, 3, 2)   # PyTorch [i, f, g, o] -> packed [i, f, o, g]


def _round_up(x, m):
    return ((x + m - 1) // m) * m


def _tpu_generation():
    try:
        kind = jax.devices()[0].device_kind.lower()
    except Exception:
        return None
    for g in ("v7", "v6", "v5"):
        if g in kind:
            return g
    return None


def _vmem_limit_bytes(gen):
    if gen == "v7":
        return 52 * 1024 * 1024       # 64 MiB physical per TC -> leave headroom
    if gen in ("v5", "v6"):
        return 100 * 1024 * 1024      # 128 MiB physical
    return 48 * 1024 * 1024           # unknown generation: stay conservative


def _pick_time_block(t, cap=32):
    """Time-chunk size; T gets padded up to a multiple of it (no TT=1 fallback)."""
    if t <= cap:
        return t
    best_tt, best_pad = cap, _round_up(t, cap)
    for tt in range(cap - 1, 7, -1):
        tp = _round_up(t, tt)
        if tp < best_pad:
            best_pad, best_tt = tp, tt
    return best_tt


def _pick_batch_block(b, hp, tt, gen, vmem_limit):
    """Batch block sized to fill the MXU M dim, bounded by the gx VMEM budget."""
    b_pad8 = _round_up(b, 8)
    if b_pad8 <= 8:
        bb = 8                          # one full-batch (8,128)-aligned block
    else:
        cap = 256 if gen in ("v6", "v7") else 128
        bb = min(_round_up(b_pad8, 16), cap)
        # gx is streamed bf16 and double-buffered; keep it under ~60% of VMEM.
        while bb > 16 and 2 * tt * bb * 4 * hp * 2 > 0.6 * vmem_limit:
            bb = max(16, _round_up(bb // 2, 16))
        # v7x has 2 TensorCores: ensure the "parallel" batch axis has >=2 blocks.
        if gen == "v7" and b_pad8 >= 32 and -(-b_pad8 // bb) < 2:
            bb = _round_up(-(-b_pad8 // 2), 16)
    # Shrink the time chunk if the gx block still does not fit the budget.
    while tt > 8 and 2 * tt * bb * 4 * hp * 2 > 0.6 * vmem_limit:
        tt //= 2
    b_pad = _round_up(b_pad8, bb)
    return bb, b_pad, tt


def _lstm_recurrent_kernel(gx_ref, whh_ref, out_ref, c_ref, *,
                           tt, hp, t_real, needs_mask, unroll):
    """One grid step = one (batch block, time chunk).

    gx_ref  : (TT, BB, 4*Hp) bf16  precomputed x @ W_ih^T + bias, gate-padded
    whh_ref : (Hp, 4*Hp)     bf16  recurrent weight W_hh^T, gate-padded
    out_ref : (BB, Hp)       f32   h state; block index is constant along the
                                   time axis so it stays VMEM-resident and
                                   doubles as the carried hidden state
    c_ref   : (BB, Hp)       f32   cell state scratch carried across chunks
    """
    t_chunk = pl.program_id(1)

    @pl.when(t_chunk == 0)
    def _():
        out_ref[...] = jnp.zeros_like(out_ref)   # h0 = 0
        c_ref[...] = jnp.zeros_like(c_ref)       # c0 = 0

    whh = whh_ref[...]                # loaded once per chunk (bf16)
    t_base = t_chunk * tt

    def step(i, carry):
        h, c = carry                                          # f32 (BB, Hp)
        gates = gx_ref[i] + jnp.dot(h.astype(jnp.bfloat16), whh,
                                    preferred_element_type=jnp.float32)
        # Packed gate order [i, f, o, g]: one fused sigmoid over 3*Hp lanes
        # (sigmoid(x) = 0.5*tanh(0.5x)+0.5 -> single EUP push per slice).
        sig = 0.5 * jnp.tanh(0.5 * gates[:, : 3 * hp]) + 0.5
        i_g = sig[:, 0 * hp:1 * hp]
        f_g = sig[:, 1 * hp:2 * hp]
        o_g = sig[:, 2 * hp:3 * hp]
        g_g = jnp.tanh(gates[:, 3 * hp:4 * hp])
        c_new = f_g * c + i_g * g_g
        h_new = o_g * jnp.tanh(c_new)
        if needs_mask:
            # Neutralize padded timesteps (time axis padded to a multiple of TT).
            valid = ((t_base + i) < t_real).astype(jnp.float32)
            h_new = valid * h_new + (1.0 - valid) * h
            c_new = valid * c_new + (1.0 - valid) * c
        return h_new, c_new

    h_f, c_f = jax.lax.fori_loop(0, tt, step, (out_ref[...], c_ref[...]),
                                 unroll=unroll)
    out_ref[...] = h_f
    c_ref[...] = c_f


def clf_forward(x, params):
    """x: (B, T, D) float32 — matches the PyTorch batch_first LSTM input."""
    B, T, D = x.shape
    H = params["w_hh"].shape[1]          # w_hh: (4H, H)
    Hp = _round_up(H, 128)               # lane-aligned per-gate width

    gen = _tpu_generation()
    vmem_limit = _vmem_limit_bytes(gen)

    TT = _pick_time_block(T)
    BB, B_pad, TT = _pick_batch_block(B, Hp, TT, gen, vmem_limit)
    T_pad = _round_up(T, TT)

    # ---- Params repacked once: gate-reordered ([i,f,o,g]) + lane-padded ------
    order = list(_GATE_ORDER)
    w_ih = params["w_ih"].reshape(4, H, D)[order, :, :]
    w_ih = jnp.pad(w_ih, ((0, 0), (0, Hp - H), (0, 0))).reshape(4 * Hp, D)
    bias = (params["b_ih"] + params["b_hh"]).reshape(4, H)[order, :]
    bias = jnp.pad(bias, ((0, 0), (0, Hp - H))).reshape(4 * Hp)
    whh = jnp.transpose(params["w_hh"].reshape(4, H, H)[order, :, :], (2, 0, 1))
    whh = jnp.pad(whh, ((0, Hp - H), (0, 0), (0, Hp - H)))
    whh = whh.reshape(Hp, 4 * Hp).astype(jnp.bfloat16)   # padded rows/cols stay 0

    # ---- Hoisted input projection: one XLA matmul, emitted directly in the
    # time-major / gate-padded / bf16 layout the kernel streams ---------------
    if B_pad != B:
        x = jnp.pad(x, ((0, B_pad - B), (0, 0), (0, 0)))
    xt = jnp.transpose(x, (1, 0, 2))                         # small (T,B_pad,D)
    gx = (jnp.einsum("tbd,hd->tbh", xt, w_ih) + bias).astype(jnp.bfloat16)
    if T_pad != T:
        gx = jnp.pad(gx, ((0, T_pad - T), (0, 0), (0, 0)))   # (T_pad,B_pad,4Hp)

    unroll = True if BB <= 32 else max(1, min(8, TT))        # partial unroll
    kernel = functools.partial(
        _lstm_recurrent_kernel, tt=TT, hp=Hp, t_real=T,
        needs_mask=(T_pad != T), unroll=unroll)

    grid_spec = pltpu.PrefetchScalarGridSpec(
        num_scalar_prefetch=0,
        grid=(B_pad // BB, T_pad // TT),
        in_specs=[
            pl.BlockSpec((TT, BB, 4 * Hp), lambda b, t: (t, b, 0)),  # gx (bf16)
            # TODO(synk): single-buffer whh (constant index_map) via
            # pipeline_mode=pl.Buffered(1) once verified safe on installed JAX.
            pl.BlockSpec((Hp, 4 * Hp), lambda b, t: (0, 0)),         # W_hh^T
        ],
        out_specs=pl.BlockSpec((BB, Hp), lambda b, t: (b, 0)),
        scratch_shapes=[
            pltpu.VMEM((BB, Hp), jnp.float32),   # c state (h lives in out_ref)
        ],
    )

    h_last = pl.pallas_call(
        kernel,
        grid_spec=grid_spec,
        out_shape=jax.ShapeDtypeStruct((B_pad, Hp), jnp.float32),
        compiler_params=pltpu.CompilerParams(
            dimension_semantics=("parallel", "arbitrary"),
            vmem_limit_bytes=vmem_limit,
        ),
    )(gx, whh)

    # ---- FC head outside the kernel: one small (B,H) x (H,C) matmul ----
    h_T = h_last[:B, :H]
    return h_T @ params["w_fc"].T + params["b_fc"]


def clf_reference(x, params):
    """Pure-JAX f32 reference of the same forward pass (for verification)."""
    B = x.shape[0]
    H = params["w_hh"].shape[1]

    def step(carry, x_t):
        h, c = carry
        gates = (x_t @ params["w_ih"].T + params["b_ih"]
                 + h @ params["w_hh"].T + params["b_hh"])
        i_g = jax.nn.sigmoid(gates[:, 0 * H:1 * H])
        f_g = jax.nn.sigmoid(gates[:, 1 * H:2 * H])
        g_g = jnp.tanh(gates[:, 2 * H:3 * H])
        o_g = jax.nn.sigmoid(gates[:, 3 * H:4 * H])
        c_new = f_g * c + i_g * g_g
        h_new = o_g * jnp.tanh(c_new)
        return (h_new, c_new), None

    h0 = jnp.zeros((B, H), jnp.float32)
    c0 = jnp.zeros((B, H), jnp.float32)
    (h_T, _), _ = jax.lax.scan(step, (h0, c0), jnp.transpose(x, (1, 0, 2)))
    return h_T @ params["w_fc"].T + params["b_fc"]


def init_params(key, input_size, hidden_size, num_classes):
    """Deterministic init mimicking PyTorch's U(-1/sqrt(H), 1/sqrt(H))."""
    k = 1.0 / jnp.sqrt(jnp.float32(hidden_size))
    keys = jax.random.split(key, 6)
    u = lambda kk, shape: jax.random.uniform(kk, shape, jnp.float32, -k, k)
    return {
        "w_ih": u(keys[0], (4 * hidden_size, input_size)),
        "w_hh": u(keys[1], (4 * hidden_size, hidden_size)),
        "b_ih": u(keys[2], (4 * hidden_size,)),
        "b_hh": u(keys[3], (4 * hidden_size,)),
        "w_fc": u(keys[4], (num_classes, hidden_size)),
        "b_fc": u(keys[5], (num_classes,)),
    }


if __name__ == "__main__":
    B, T, D, H, C = 2, 8, 16, 32, 10
    key = jax.random.PRNGKey(0)
    k_x, k_p = jax.random.split(key)

    x = jax.random.normal(k_x, (B, T, D), jnp.float32)
    params = init_params(k_p, D, H, C)

    out = jax.block_until_ready(clf_forward(x, params))
    ref = clf_reference(x, params)

    assert out.shape == (B, C)
    # Tolerance loosened vs 1e-5 because both the recurrent matmul and the gx
    # stream are bf16 (f32 accumulation); gate/cell math stays f32.
    assert jnp.allclose(out, ref, atol=5e-2, rtol=5e-2), "mismatch vs reference"

    print("KERNEL_OK")
</pallas_src>

<mosaic_0001>
module attributes {stable_mosaic.version = 11 : i64} {
  func.func @_lstm_recurrent_kernel(%arg0: i32, %arg1: i32, %arg2: memref<8x8x512xbf16, #tpu.memory_space<vmem>>, %arg3: memref<128x512xbf16, #tpu.memory_space<vmem>>, %arg4: memref<8x128xf32, #tpu.memory_space<vmem>>, %arg5: memref<8x128xf32, #tpu.memory_space<vmem>>) attributes {dimension_semantics = [#tpu.dimension_semantics<parallel>, #tpu.dimension_semantics<arbitrary>], iteration_bounds = array<i64: 1, 1>, scalar_prefetch = 0 : i64, scratch_operands = 1 : i64, tpu.core_type = #tpu.core_type<tc>, window_params = [{transform_indices = @transform_0, window_bounds = array<i64: 8, 8, 512>}, {pipeline_mode = #tpu.pipeline_mode<synchronous>, transform_indices = @transform_1, window_bounds = array<i64: 128, 512>}, {transform_indices = @transform_2, window_bounds = array<i64: 8, 128>}]} {
    %c0_i32 = arith.constant 0 : i32
    %0 = arith.cmpi eq, %arg1, %c0_i32 : i32
    %1 = arith.extui %0 : i1 to i32
    %c0_i32_0 = arith.constant 0 : i32
    %2 = arith.cmpi ne, %1, %c0_i32_0 : i32
    scf.if %2 {
      %cst_58 = arith.constant 0.000000e+00 : f32
      %208 = vector.broadcast %cst_58 : f32 to vector<8x128xf32>
      %c0_59 = arith.constant 0 : index
      %c0_60 = arith.constant 0 : index
      %209 = vector.load %arg4[%c0_59, %c0_60] : memref<8x128xf32, #tpu.memory_space<vmem>>, vector<8x128xf32>
      tpu.vector_store %arg4[%c0_59, %c0_60], %208 {strides = array<i32>} : memref<8x128xf32, #tpu.memory_space<vmem>>, vector<8x128xf32>,
      %cst_61 = arith.constant 0.000000e+00 : f32
      %210 = vector.broadcast %cst_61 : f32 to vector<8x128xf32>
      %c0_62 = arith.constant 0 : index
      %c0_63 = arith.constant 0 : index
      %211 = vector.load %arg5[%c0_62, %c0_63] : memref<8x128xf32, #tpu.memory_space<vmem>>, vector<8x128xf32>
      tpu.vector_store %arg5[%c0_62, %c0_63], %210 {strides = array<i32>} : memref<8x128xf32, #tpu.memory_space<vmem>>, vector<8x128xf32>,
    } else {
    }
    %c0 = arith.constant 0 : index
    %c0_1 = arith.constant 0 : index
    %3 = vector.load %arg3[%c0, %c0_1] : memref<128x512xbf16, #tpu.memory_space<vmem>>, vector<128x512xbf16>
    %c0_2 = arith.constant 0 : index
    %c0_3 = arith.constant 0 : index
    %4 = vector.load %arg4[%c0_2, %c0_3] : memref<8x128xf32, #tpu.memory_space<vmem>>, vector<8x128xf32>
    %c0_4 = arith.constant 0 : index
    %c0_5 = arith.constant 0 : index
    %5 = vector.load %arg5[%c0_4, %c0_5] : memref<8x128xf32, #tpu.memory_space<vmem>>, vector<8x128xf32>
    %c0_i32_6 = arith.constant 0 : i32
    %6 = arith.index_cast %c0_i32_6 : i32 to index
    %c0_7 = arith.constant 0 : index
    %c0_8 = arith.constant 0 : index
    %7 = vector.load %arg2[%6, %c0_7, %c0_8] : memref<8x8x512xbf16, #tpu.memory_space<vmem>>, vector<1x8x512xbf16>
    %8 = vector.shape_cast %7 : vector<1x8x512xbf16> to vector<8x512xbf16>
    %9 = arith.truncf %4 : vector<8x128xf32> to vector<8x128xbf16>
    %cst = arith.constant dense<0.000000e+00> : vector<8x512xf32>
    %10 = tpu.matmul %9, %3, %cst {dimension_numbers = #tpu.dot_dimension_numbers<[1], [0], [0], [1], [0, 0, 1, 1], [], []>} : vector<8x128xbf16>, vector<128x512xbf16>, vector<8x512xf32> -> vector<8x512xf32>
    %11 = arith.extf %8 : vector<8x512xbf16> to vector<8x512xf32>
    %12 = arith.addf %11, %10 : vector<8x512xf32>
    %13 = vector.extract_strided_slice %12 {offsets = [0, 0], sizes = [8, 384], strides = [1, 1]} : vector<8x512xf32> to vector<8x384xf32>
    %cst_9 = arith.constant 5.000000e-01 : f32
    %14 = vector.broadcast %cst_9 : f32 to vector<8x384xf32>
    %15 = arith.mulf %14, %13 : vector<8x384xf32>
    %16 = math.tanh %15 : vector<8x384xf32>
    %cst_10 = arith.constant 5.000000e-01 : f32
    %17 = vector.broadcast %cst_10 : f32 to vector<8x384xf32>
    %18 = arith.mulf %17, %16 : vector<8x384xf32>
    %cst_11 = arith.constant 5.000000e-01 : f32
    %19 = vector.broadcast %cst_11 : f32 to vector<8x384xf32>
    %20 = arith.addf %18, %19 : vector<8x384xf32>
    %21 = vector.extract_strided_slice %20 {offsets = [0, 0], sizes = [8, 128], strides = [1, 1]} : vector<8x384xf32> to vector<8x128xf32>
    %22 = vector.extract_strided_slice %20 {offsets = [0, 128], sizes = [8, 128], strides = [1, 1]} : vector<8x384xf32> to vector<8x128xf32>
    %23 = vector.extract_strided_slice %20 {offsets = [0, 256], sizes = [8, 128], strides = [1, 1]} : vector<8x384xf32> to vector<8x128xf32>
    %24 = vector.extract_strided_slice %12 {offsets = [0, 384], sizes = [8, 128], strides = [1, 1]} : vector<8x512xf32> to vector<8x128xf32>
    %25 = math.tanh %24 : vector<8x128xf32>
    %26 = arith.mulf %22, %5 : vector<8x128xf32>
    %27 = arith.mulf %21, %25 : vector<8x128xf32>
    %28 = arith.addf %26, %27 : vector<8x128xf32>
    %29 = math.tanh %28 : vector<8x128xf32>
    %30 = arith.mulf %23, %29 : vector<8x128xf32>
    %c1_i32 = arith.constant 1 : i32
    %31 = arith.index_cast %c1_i32 : i32 to index
    %c0_12 = arith.constant 0 : index
    %c0_13 = arith.constant 0 : index
    %32 = vector.load %arg2[%31, %c0_12, %c0_13] : memref<8x8x512xbf16, #tpu.memory_space<vmem>>, vector<1x8x512xbf16>
    %33 = vector.shape_cast %32 : vector<1x8x512xbf16> to vector<8x512xbf16>
    %34 = arith.truncf %30 : vector<8x128xf32> to vector<8x128xbf16>
    %cst_14 = arith.constant dense<0.000000e+00> : vector<8x512xf32>
    %35 = tpu.matmul %34, %3, %cst_14 {dimension_numbers = #tpu.dot_dimension_numbers<[1], [0], [0], [1], [0, 0, 1, 1], [], []>} : vector<8x128xbf16>, vector<128x512xbf16>, vector<8x512xf32> -> vector<8x512xf32>
    %36 = arith.extf %33 : vector<8x512xbf16> to vector<8x512xf32>
    %37 = arith.addf %36, %35 : vector<8x512xf32>
    %38 = vector.extract_strided_slice %37 {offsets = [0, 0], sizes = [8, 384], strides = [1, 1]} : vector<8x512xf32> to vector<8x384xf32>
    %cst_15 = arith.constant 5.000000e-01 : f32
    %39 = vector.broadcast %cst_15 : f32 to vector<8x384xf32>
    %40 = arith.mulf %39, %38 : vector<8x384xf32>
    %41 = math.tanh %40 : vector<8x384xf32>
    %cst_16 = arith.constant 5.000000e-01 : f32
    %42 = vector.broadcast %cst_16 : f32 to vector<8x384xf32>
    %43 = arith.mulf %42, %41 : vector<8x384xf32>
    %cst_17 = arith.constant 5.000000e-01 : f32
    %44 = vector.broadcast %cst_17 : f32 to vector<8x384xf32>
    %45 = arith.addf %43, %44 : vector<8x384xf32>
    %46 = vector.extract_strided_slice %45 {offsets = [0, 0], sizes = [8, 128], strides = [1, 1]} : vector<8x384xf32> to vector<8x128xf32>
    %47 = vector.extract_strided_slice %45 {offsets = [0, 128], sizes = [8, 128], strides = [1, 1]} : vector<8x384xf32> to vector<8x128xf32>
    %48 = vector.extract_strided_slice %45 {offsets = [0, 256], sizes = [8, 128], strides = [1, 1]} : vector<8x384xf32> to vector<8x128xf32>
    %49 = vector.extract_strided_slice %37 {offsets = [0, 384], sizes = [8, 128], strides = [1, 1]} : vector<8x512xf32> to vector<8x128xf32>
    %50 = math.tanh %49 : vector<8x128xf32>
    %51 = arith.mulf %47, %28 : vector<8x128xf32>
    %52 = arith.mulf %46, %50 : vector<8x128xf32>
    %53 = arith.addf %51, %52 : vector<8x128xf32>
    %54 = math.tanh %53 : vector<8x128xf32>
    %55 = arith.mulf %48, %54 : vector<8x128xf32>
    %c2_i32 = arith.constant 2 : i32
    %56 = arith.index_cast %c2_i32 : i32 to index
    %c0_18 = arith.constant 0 : index
    %c0_19 = arith.constant 0 : index
    %57 = vector.load %arg2[%56, %c0_18, %c0_19] : memref<8x8x512xbf16, #tpu.memory_space<vmem>>, vector<1x8x512xbf16>
    %58 = vector.shape_cast %57 : vector<1x8x512xbf16> to vector<8x512xbf16>
    %59 = arith.truncf %55 : vector<8x128xf32> to vector<8x128xbf16>
    %cst_20 = arith.constant dense<0.000000e+00> : vector<8x512xf32>
    %60 = tpu.matmul %59, %3, %cst_20 {dimension_numbers = #tpu.dot_dimension_numbers<[1], [0], [0], [1], [0, 0, 1, 1], [], []>} : vector<8x128xbf16>, vector<128x512xbf16>, vector<8x512xf32> -> vector<8x512xf32>
    %61 = arith.extf %58 : vector<8x512xbf16> to vector<8x512xf32>
    %62 = arith.addf %61, %60 : vector<8x512xf32>
    %63 = vector.extract_strided_slice %62 {offsets = [0, 0], sizes = [8, 384], strides = [1, 1]} : vector<8x512xf32> to vector<8x384xf32>
    %cst_21 = arith.constant 5.000000e-01 : f32
    %64 = vector.broadcast %cst_21 : f32 to vector<8x384xf32>
    %65 = arith.mulf %64, %63 : vector<8x384xf32>
    %66 = math.tanh %65 : vector<8x384xf32>
    %cst_22 = arith.constant 5.000000e-01 : f32
    %67 = vector.broadcast %cst_22 : f32 to vector<8x384xf32>
    %68 = arith.mulf %67, %66 : vector<8x384xf32>
    %cst_23 = arith.constant 5.000000e-01 : f32
    %69 = vector.broadcast %cst_23 : f32 to vector<8x384xf32>
    %70 = arith.addf %68, %69 : vector<8x384xf32>
    %71 = vector.extract_strided_slice %70 {offsets = [0, 0], sizes = [8, 128], strides = [1, 1]} : vector<8x384xf32> to vector<8x128xf32>
    %72 = vector.extract_strided_slice %70 {offsets = [0, 128], sizes = [8, 128], strides = [1, 1]} : vector<8x384xf32> to vector<8x128xf32>
    %73 = vector.extract_strided_slice %70 {offsets = [0, 256], sizes = [8, 128], strides = [1, 1]} : vector<8x384xf32> to vector<8x128xf32>
    %74 = vector.extract_strided_slice %62 {offsets = [0, 384], sizes = [8, 128], strides = [1, 1]} : vector<8x512xf32> to vector<8x128xf32>
    %75 = math.tanh %74 : vector<8x128xf32>
    %76 = arith.mulf %72, %53 : vector<8x128xf32>
    %77 = arith.mulf %71, %75 : vector<8x128xf32>
    %78 = arith.addf %76, %77 : vector<8x128xf32>
    %79 = math.tanh %78 : vector<8x128xf32>
    %80 = arith.mulf %73, %79 : vector<8x128xf32>
    %c3_i32 = arith.constant 3 : i32
    %81 = arith.index_cast %c3_i32 : i32 to index
    %c0_24 = arith.constant 0 : index
    %c0_25 = arith.constant 0 : index
    %82 = vector.load %arg2[%81, %c0_24, %c0_25] : memref<8x8x512xbf16, #tpu.memory_space<vmem>>, vector<1x8x512xbf16>
    %83 = vector.shape_cast %82 : vector<1x8x512xbf16> to vector<8x512xbf16>
    %84 = arith.truncf %80 : vector<8x128xf32> to vector<8x128xbf16>
    %cst_26 = arith.constant dense<0.000000e+00> : vector<8x512xf32>
    %85 = tpu.matmul %84, %3, %cst_26 {dimension_numbers = #tpu.dot_dimension_numbers<[1], [0], [0], [1], [0, 0, 1, 1], [], []>} : vector<8x128xbf16>, vector<128x512xbf16>, vector<8x512xf32> -> vector<8x512xf32>
    %86 = arith.extf %83 : vector<8x512xbf16> to vector<8x512xf32>
    %87 = arith.addf %86, %85 : vector<8x512xf32>
    %88 = vector.extract_strided_slice %87 {offsets = [0, 0], sizes = [8, 384], strides = [1, 1]} : vector<8x512xf32> to vector<8x384xf32>
    %cst_27 = arith.constant 5.000000e-01 : f32
    %89 = vector.broadcast %cst_27 : f32 to vector<8x384xf32>
    %90 = arith.mulf %89, %88 : vector<8x384xf32>
    %91 = math.tanh %90 : vector<8x384xf32>
    %cst_28 = arith.constant 5.000000e-01 : f32
    %92 = vector.broadcast %cst_28 : f32 to vector<8x384xf32>
    %93 = arith.mulf %92, %91 : vector<8x384xf32>
    %cst_29 = arith.constant 5.000000e-01 : f32
    %94 = vector.broadcast %cst_29 : f32 to vector<8x384xf32>
    %95 = arith.addf %93, %94 : vector<8x384xf32>
    %96 = vector.extract_strided_slice %95 {offsets = [0, 0], sizes = [8, 128], strides = [1, 1]} : vector<8x384xf32> to vector<8x128xf32>
    %97 = vector.extract_strided_slice %95 {offsets = [0, 128], sizes = [8, 128], strides = [1, 1]} : vector<8x384xf32> to vector<8x128xf32>
    %98 = vector.extract_strided_slice %95 {offsets = [0, 256], sizes = [8, 128], strides = [1, 1]} : vector<8x384xf32> to vector<8x128xf32>
    %99 = vector.extract_strided_slice %87 {offsets = [0, 384], sizes = [8, 128], strides = [1, 1]} : vector<8x512xf32> to vector<8x128xf32>
    %100 = math.tanh %99 : vector<8x128xf32>
    %101 = arith.mulf %97, %78 : vector<8x128xf32>
    %102 = arith.mulf %96, %100 : vector<8x128xf32>
    %103 = arith.addf %101, %102 : vector<8x128xf32>
    %104 = math.tanh %103 : vector<8x128xf32>
    %105 = arith.mulf %98, %104 : vector<8x128xf32>
    %c4_i32 = arith.constant 4 : i32
    %106 = arith.index_cast %c4_i32 : i32 to index
    %c0_30 = arith.constant 0 : index
    %c0_31 = arith.constant 0 : index
    %107 = vector.load %arg2[%106, %c0_30, %c0_31] : memref<8x8x512xbf16, #tpu.memory_space<vmem>>, vector<1x8x512xbf16>
    %108 = vector.shape_cast %107 : vector<1x8x512xbf16> to vector<8x512xbf16>
    %109 = arith.truncf %105 : vector<8x128xf32> to vector<8x128xbf16>
    %cst_32 = arith.constant dense<0.000000e+00> : vector<8x512xf32>
    %110 = tpu.matmul %109, %3, %cst_32 {dimension_numbers = #tpu.dot_dimension_numbers<[1], [0], [0], [1], [0, 0, 1, 1], [], []>} : vector<8x128xbf16>, vector<128x512xbf16>, vector<8x512xf32> -> vector<8x512xf32>
    %111 = arith.extf %108 : vector<8x512xbf16> to vector<8x512xf32>
    %112 = arith.addf %111, %110 : vector<8x512xf32>
    %113 = vector.extract_strided_slice %112 {offsets = [0, 0], sizes = [8, 384], strides = [1, 1]} : vector<8x512xf32> to vector<8x384xf32>
    %cst_33 = arith.constant 5.000000e-01 : f32
    %114 = vector.broadcast %cst_33 : f32 to vector<8x384xf32>
    %115 = arith.mulf %114, %113 : vector<8x384xf32>
    %116 = math.tanh %115 : vector<8x384xf32>
    %cst_34 = arith.constant 5.000000e-01 : f32
    %117 = vector.broadcast %cst_34 : f32 to vector<8x384xf32>
    %118 = arith.mulf %117, %116 : vector<8x384xf32>
    %cst_35 = arith.constant 5.000000e-01 : f32
    %119 = vector.broadcast %cst_35 : f32 to vector<8x384xf32>
    %120 = arith.addf %118, %119 : vector<8x384xf32>
    %121 = vector.extract_strided_slice %120 {offsets = [0, 0], sizes = [8, 128], strides = [1, 1]} : vector<8x384xf32> to vector<8x128xf32>
    %122 = vector.extract_strided_slice %120 {offsets = [0, 128], sizes = [8, 128], strides = [1, 1]} : vector<8x384xf32> to vector<8x128xf32>
    %123 = vector.extract_strided_slice %120 {offsets = [0, 256], sizes = [8, 128], strides = [1, 1]} : vector<8x384xf32> to vector<8x128xf32>
    %124 = vector.extract_strided_slice %112 {offsets = [0, 384], sizes = [8, 128], strides = [1, 1]} : vector<8x512xf32> to vector<8x128xf32>
    %125 = math.tanh %124 : vector<8x128xf32>
    %126 = arith.mulf %122, %103 : vector<8x128xf32>
    %127 = arith.mulf %121, %125 : vector<8x128xf32>
    %128 = arith.addf %126, %127 : vector<8x128xf32>
    %129 = math.tanh %128 : vector<8x128xf32>
    %130 = arith.mulf %123, %129 : vector<8x128xf32>
    %c5_i32 = arith.constant 5 : i32
    %131 = arith.index_cast %c5_i32 : i32 to index
    %c0_36 = arith.constant 0 : index
    %c0_37 = arith.constant 0 : index
    %132 = vector.load %arg2[%131, %c0_36, %c0_37] : memref<8x8x512xbf16, #tpu.memory_space<vmem>>, vector<1x8x512xbf16>
    %133 = vector.shape_cast %132 : vector<1x8x512xbf16> to vector<8x512xbf16>
    %134 = arith.truncf %130 : vector<8x128xf32> to vector<8x128xbf16>
    %cst_38 = arith.constant dense<0.000000e+00> : vector<8x512xf32>
    %135 = tpu.matmul %134, %3, %cst_38 {dimension_numbers = #tpu.dot_dimension_numbers<[1], [0], [0], [1], [0, 0, 1, 1], [], []>} : vector<8x128xbf16>, vector<128x512xbf16>, vector<8x512xf32> -> vector<8x512xf32>
    %136 = arith.extf %133 : vector<8x512xbf16> to vector<8x512xf32>
    %137 = arith.addf %136, %135 : vector<8x512xf32>
    %138 = vector.extract_strided_slice %137 {offsets = [0, 0], sizes = [8, 384], strides = [1, 1]} : vector<8x512xf32> to vector<8x384xf32>
    %cst_39 = arith.constant 5.000000e-01 : f32
    %139 = vector.broadcast %cst_39 : f32 to vector<8x384xf32>
    %140 = arith.mulf %139, %138 : vector<8x384xf32>
    %141 = math.tanh %140 : vector<8x384xf32>
    %cst_40 = arith.constant 5.000000e-01 : f32
    %142 = vector.broadcast %cst_40 : f32 to vector<8x384xf32>
    %143 = arith.mulf %142, %141 : vector<8x384xf32>
    %cst_41 = arith.constant 5.000000e-01 : f32
    %144 = vector.broadcast %cst_41 : f32 to vector<8x384xf32>
    %145 = arith.addf %143, %144 : vector<8x384xf32>
    %146 = vector.extract_strided_slice %145 {offsets = [0, 0], sizes = [8, 128], strides = [1, 1]} : vector<8x384xf32> to vector<8x128xf32>
    %147 = vector.extract_strided_slice %145 {offsets = [0, 128], sizes = [8, 128], strides = [1, 1]} : vector<8x384xf32> to vector<8x128xf32>
    %148 = vector.extract_strided_slice %145 {offsets = [0, 256], sizes = [8, 128], strides = [1, 1]} : vector<8x384xf32> to vector<8x128xf32>
    %149 = vector.extract_strided_slice %137 {offsets = [0, 384], sizes = [8, 128], strides = [1, 1]} : vector<8x512xf32> to vector<8x128xf32>
    %150 = math.tanh %149 : vector<8x128xf32>
    %151 = arith.mulf %147, %128 : vector<8x128xf32>
    %152 = arith.mulf %146, %150 : vector<8x128xf32>
    %153 = arith.addf %151, %152 : vector<8x128xf32>
    %154 = math.tanh %153 : vector<8x128xf32>
    %155 = arith.mulf %148, %154 : vector<8x128xf32>
    %c6_i32 = arith.constant 6 : i32
    %156 = arith.index_cast %c6_i32 : i32 to index
    %c0_42 = arith.constant 0 : index
    %c0_43 = arith.constant 0 : index
    %157 = vector.load %arg2[%156, %c0_42, %c0_43] : memref<8x8x512xbf16, #tpu.memory_space<vmem>>, vector<1x8x512xbf16>
    %158 = vector.shape_cast %157 : vector<1x8x512xbf16> to vector<8x512xbf16>
    %159 = arith.truncf %155 : vector<8x128xf32> to vector<8x128xbf16>
    %cst_44 = arith.constant dense<0.000000e+00> : vector<8x512xf32>
    %160 = tpu.matmul %159, %3, %cst_44 {dimension_numbers = #tpu.dot_dimension_numbers<[1], [0], [0], [1], [0, 0, 1, 1], [], []>} : vector<8x128xbf16>, vector<128x512xbf16>, vector<8x512xf32> -> vector<8x512xf32>
    %161 = arith.extf %158 : vector<8x512xbf16> to vector<8x512xf32>
    %162 = arith.addf %161, %160 : vector<8x512xf32>
    %163 = vector.extract_strided_slice %162 {offsets = [0, 0], sizes = [8, 384], strides = [1, 1]} : vector<8x512xf32> to vector<8x384xf32>
    %cst_45 = arith.constant 5.000000e-01 : f32
    %164 = vector.broadcast %cst_45 : f32 to vector<8x384xf32>
    %165 = arith.mulf %164, %163 : vector<8x384xf32>
    %166 = math.tanh %165 : vector<8x384xf32>
    %cst_46 = arith.constant 5.000000e-01 : f32
    %167 = vector.broadcast %cst_46 : f32 to vector<8x384xf32>
    %168 = arith.mulf %167, %166 : vector<8x384xf32>
    %cst_47 = arith.constant 5.000000e-01 : f32
    %169 = vector.broadcast %cst_47 : f32 to vector<8x384xf32>
    %170 = arith.addf %168, %169 : vector<8x384xf32>
    %171 = vector.extract_strided_slice %170 {offsets = [0, 0], sizes = [8, 128], strides = [1, 1]} : vector<8x384xf32> to vector<8x128xf32>
    %172 = vector.extract_strided_slice %170 {offsets = [0, 128], sizes = [8, 128], strides = [1, 1]} : vector<8x384xf32> to vector<8x128xf32>
    %173 = vector.extract_strided_slice %170 {offsets = [0, 256], sizes = [8, 128], strides = [1, 1]} : vector<8x384xf32> to vector<8x128xf32>
    %174 = vector.extract_strided_slice %162 {offsets = [0, 384], sizes = [8, 128], strides = [1, 1]} : vector<8x512xf32> to vector<8x128xf32>
    %175 = math.tanh %174 : vector<8x128xf32>
    %176 = arith.mulf %172, %153 : vector<8x128xf32>
    %177 = arith.mulf %171, %175 : vector<8x128xf32>
    %178 = arith.addf %176, %177 : vector<8x128xf32>
    %179 = math.tanh %178 : vector<8x128xf32>
    %180 = arith.mulf %173, %179 : vector<8x128xf32>
    %c7_i32 = arith.constant 7 : i32
    %181 = arith.index_cast %c7_i32 : i32 to index
    %c0_48 = arith.constant 0 : index
    %c0_49 = arith.constant 0 : index
    %182 = vector.load %arg2[%181, %c0_48, %c0_49] : memref<8x8x512xbf16, #tpu.memory_space<vmem>>, vector<1x8x512xbf16>
    %183 = vector.shape_cast %182 : vector<1x8x512xbf16> to vector<8x512xbf16>
    %184 = arith.truncf %180 : vector<8x128xf32> to vector<8x128xbf16>
    %cst_50 = arith.constant dense<0.000000e+00> : vector<8x512xf32>
    %185 = tpu.matmul %184, %3, %cst_50 {dimension_numbers = #tpu.dot_dimension_numbers<[1], [0], [0], [1], [0, 0, 1, 1], [], []>} : vector<8x128xbf16>, vector<128x512xbf16>, vector<8x512xf32> -> vector<8x512xf32>
    %186 = arith.extf %183 : vector<8x512xbf16> to vector<8x512xf32>
    %187 = arith.addf %186, %185 : vector<8x512xf32>
    %188 = vector.extract_strided_slice %187 {offsets = [0, 0], sizes = [8, 384], strides = [1, 1]} : vector<8x512xf32> to vector<8x384xf32>
    %cst_51 = arith.constant 5.000000e-01 : f32
    %189 = vector.broadcast %cst_51 : f32 to vector<8x384xf32>
    %190 = arith.mulf %189, %188 : vector<8x384xf32>
    %191 = math.tanh %190 : vector<8x384xf32>
    %cst_52 = arith.constant 5.000000e-01 : f32
    %192 = vector.broadcast %cst_52 : f32 to vector<8x384xf32>
    %193 = arith.mulf %192, %191 : vector<8x384xf32>
    %cst_53 = arith.constant 5.000000e-01 : f32
    %194 = vector.broadcast %cst_53 : f32 to vector<8x384xf32>
    %195 = arith.addf %193, %194 : vector<8x384xf32>
    %196 = vector.extract_strided_slice %195 {offsets = [0, 0], sizes = [8, 128], strides = [1, 1]} : vector<8x384xf32> to vector<8x128xf32>
    %197 = vector.extract_strided_slice %195 {offsets = [0, 128], sizes = [8, 128], strides = [1, 1]} : vector<8x384xf32> to vector<8x128xf32>
    %198 = vector.extract_strided_slice %195 {offsets = [0, 256], sizes = [8, 128], strides = [1, 1]} : vector<8x384xf32> to vector<8x128xf32>
    %199 = vector.extract_strided_slice %187 {offsets = [0, 384], sizes = [8, 128], strides = [1, 1]} : vector<8x512xf32> to vector<8x128xf32>
    %200 = math.tanh %199 : vector<8x128xf32>
    %201 = arith.mulf %197, %178 : vector<8x128xf32>
    %202 = arith.mulf %196, %200 : vector<8x128xf32>
    %203 = arith.addf %201, %202 : vector<8x128xf32>
    %204 = math.tanh %203 : vector<8x128xf32>
    %205 = arith.mulf %198, %204 : vector<8x128xf32>
    %c8_i32 = arith.constant 8 : i32
    %c0_54 = arith.constant 0 : index
    %c0_55 = arith.constant 0 : index
    %206 = vector.load %arg4[%c0_54, %c0_55] : memref<8x128xf32, #tpu.memory_space<vmem>>, vector<8x128xf32>
    tpu.vector_store %arg4[%c0_54, %c0_55], %205 {strides = array<i32>} : memref<8x128xf32, #tpu.memory_space<vmem>>, vector<8x128xf32>,
    %c0_56 = arith.constant 0 : index
    %c0_57 = arith.constant 0 : index
    %207 = vector.load %arg5[%c0_56, %c0_57] : memref<8x128xf32, #tpu.memory_space<vmem>>, vector<8x128xf32>
    tpu.vector_store %arg5[%c0_56, %c0_57], %203 {strides = array<i32>} : memref<8x128xf32, #tpu.memory_space<vmem>>, vector<8x128xf32>,
    return
  }
  func.func @transform_0(%arg0: i32, %arg1: i32) -> (i32, i32, i32) {
    %c0_i32 = arith.constant 0 : i32
    %c0_i32_0 = arith.constant 0 : i32
    return %arg1, %arg0, %c0_i32 : i32, i32, i32
  }
  func.func @transform_1(%arg0: i32, %arg1: i32) -> (i32, i32) {
    %c0_i32 = arith.constant 0 : i32
    %c0_i32_0 = arith.constant 0 : i32
    %c0_i32_1 = arith.constant 0 : i32
    return %c0_i32, %c0_i32_0 : i32, i32
  }
  func.func @transform_2(%arg0: i32, %arg1: i32) -> (i32, i32) {
    %c0_i32 = arith.constant 0 : i32
    %c0_i32_0 = arith.constant 0 : i32
    return %arg0, %c0_i32 : i32, i32
  }
}

</mosaic_0001>

<bundles_post_ra>
// kernel: tpu_custom_call.1
= control target key start
LH: loop header
LB: loop body
LE: loop exit
PB: predicated region body
PF: predicated region fallthrough
CT: control target
= control target key end

     0   :  { %7 = vsyncpa [#allocation4], 0  ;;  %s1778_s0 = inlined_call_operand.hbm [shape: bf16[8,8,512], index: 0, kind: input, shape index: {}]   ;;  %s1779_s1 = inlined_call_operand.hbm [shape: bf16[128,512], index: 1, kind: input, shape index: {}]   ;;  %s1780_s2 = inlined_call_operand.hbm [shape: f32[8,128], index: 2, kind: output, shape index: {}]  }
   0x1   :  { %8 = vsyncpa [#allocation7], 0 }
   0x2   :  { %9 = vsyncpa [#allocation5], 0  ;;  %s1417_s9 = smov [#allocation3]  }
   0x3   :  { %s15_s10 = sshll.u32 %s1417_s9, 4  ;;  %s16_s10 = int_to_ptr.vmem [resolvable:$true] %s15_s10 }
   0x4   :  { %s1359_s11 = scalar_lea.vmem %s16_s10, 2048  ;;  %p1364_p1 = scmp.lt.s32.totalorder %s16_s10, %s16_s10 }
   0x5   :  { %p1360_p0 = scmp.ne.s32.totalorder %s16_s10, %s1359_s11  ;;  %p1365_p2 = scmp.lt.s32.totalorder %s1359_s11, %s1359_s11 }
   0x7   :  { %p1366_p3 = por %p1365_p2, %p1364_p1 }
   0x9   :  { %p1367_p4 = pnand %p1366_p3, %p1360_p0 }
   0xb   :  { %1370 = shalt.err (!%p1367_p4)
}
   0xc   :  { %s1418_s12 = smov 256   ;;  %s1419_s13 = smov 16  }
   0xd   :  { %21 = dma.hbm_to_vmem [thread:$0]  %s1778_s0, 2048, %s16_s10, [#allocation4], %s1418_s12, %s1418_s12, %s1419_s13  }
   0xe   :  { %s1420_s16 = smov [#allocation6]  }
   0xf   :  { %s27_s17 = sshll.u32 %s1420_s16, 4  ;;  %s28_s17 = int_to_ptr.vmem [resolvable:$true] %s27_s17 }
  0x10   :  { %s1379_s18 = scalar_lea.vmem %s28_s17, 4096  ;;  %p1384_p6 = scmp.lt.s32.totalorder %s28_s17, %s28_s17 }
  0x11   :  { %p1380_p5 = scmp.ne.s32.totalorder %s28_s17, %s1379_s18  ;;  %p1385_p7 = scmp.lt.s32.totalorder %s1379_s18, %s1379_s18 }
  0x13   :  { %p1386_p8 = por %p1385_p7, %p1384_p6 }
  0x15   :  { %p1387_p9 = pnand %p1386_p8, %p1380_p5 }
  0x17   :  { %1390 = shalt.err (!%p1387_p9)
}
  0x18   :  { %33 = dma.hbm_to_vmem [thread:$0]  %s1779_s1, 4096, %s28_s17, [#allocation7], %s1418_s12, %s1418_s12, %s1419_s13  }
  0x19   :  { %1411 = dma.done.wait [#allocation4], 2048  }
  0x1a   :  { %1412 = vsyncadd [#allocation4], 4294965248 }
  0x1b   :  { %1413 = dma.done.wait [#allocation7], 4096  }
  0x1c   :  { %1414 = vsyncadd [#allocation7], 4294963200  ;;  %v1421_v0 = vmov 0   ;;  %v1447_v1 = vld [vmem:[#allocation6 + $0xe4] ss:$16 sps:$4 sm:$0xff]   ;;  %v1422_v33 = vmov 0.0|0.0  }
  0x1d   :  { %276 = vmatprep.mubr.bf16.mxu0 %v1421_v0  ;;  %317 = vmatprep.mubr.bf16.mxu1 %v1421_v0  ;;  %v1449_v2 = vld [vmem:[#allocation6 + $0xec] ss:$16 sps:$4 sm:$0xff]   ;;  %v1452_v3 = vld [vmem:[#allocation6 + $0xe0] ss:$16 sps:$4 sm:$0xff]   ;;  %v1454_v4 = vld [vmem:[#allocation6 + $0xe8] ss:$16 sps:$4 sm:$0xff]  }
  0x1e   :  { %244 = vmatprep.subr.bf16.mxu0 %v1447_v1  ;;  %285 = vmatprep.subr.bf16.mxu1 %v1449_v2  ;;  %v1457_v5 = vld [vmem:[#allocation6 + $0xc4] ss:$16 sps:$4 sm:$0xff]   ;;  %v1461_v6 = vld [vmem:[#allocation6 + $0xcc] ss:$16 sps:$4 sm:$0xff]   ;;  %v1463_v7 = vld [vmem:[#allocation6 + $0xc0] ss:$16 sps:$4 sm:$0xff]  }
  0x1f   :  { %245 = vmatpush1.bf16.msra.mxu0 %v1452_v3  ;;  %286 = vmatpush1.bf16.msra.mxu1 %v1454_v4  ;;  %v1466_v8 = vld [vmem:[#allocation6 + $0xc8] ss:$16 sps:$4 sm:$0xff]   ;;  %v1469_v9 = vld [vmem:[#allocation6 + $0xa4] ss:$16 sps:$4 sm:$0xff]   ;;  %v1471_v10 = vld [vmem:[#allocation6 + $0xac] ss:$16 sps:$4 sm:$0xff]  }
  0x20   :  { %246 = vmatprep.subr.bf16.mxu0 %v1457_v5  ;;  %287 = vmatprep.subr.bf16.mxu1 %v1461_v6  ;;  %v1473_v11 = vld [vmem:[#allocation6 + $0xa0] ss:$16 sps:$4 sm:$0xff]   ;;  %v1475_v12 = vld [vmem:[#allocation6 + $0xa8] ss:$16 sps:$4 sm:$0xff]   ;;  %v1479_v13 = vld [vmem:[#allocation6 + $0x84] ss:$16 sps:$4 sm:$0xff]  }
  0x21   :  { %v1483_v14 = vld [vmem:[#allocation6 + $0x8c] ss:$16 sps:$4 sm:$0xff]   ;;  %v1485_v15 = vld [vmem:[#allocation6 + $0x80] ss:$16 sps:$4 sm:$0xff]   ;;  %v1489_v16 = vld [vmem:[#allocation6 + $0x88] ss:$16 sps:$4 sm:$0xff]  }
  0x22   :  { %v1491_v17 = vld [vmem:[#allocation6 + $0x64] ss:$16 sps:$4 sm:$0xff]   ;;  %v1495_v18 = vld [vmem:[#allocation6 + $0x6c] ss:$16 sps:$4 sm:$0xff]   ;;  %v1497_v19 = vld [vmem:[#allocation6 + $0x60] ss:$16 sps:$4 sm:$0xff]  }
  0x23   :  { %247 = vmatpush1.bf16.msra.mxu0 %v1463_v7  ;;  %288 = vmatpush1.bf16.msra.mxu1 %v1466_v8  ;;  %v1499_v20 = vld [vmem:[#allocation6 + $0x68] ss:$16 sps:$4 sm:$0xff]   ;;  %v1503_v21 = vld [vmem:[#allocation6 + $0x44] ss:$16 sps:$4 sm:$0xff]   ;;  %v1507_v22 = vld [vmem:[#allocation6 + $0x4c] ss:$16 sps:$4 sm:$0xff]  }
  0x24   :  { %248 = vmatprep.subr.bf16.mxu0 %v1469_v9  ;;  %289 = vmatprep.subr.bf16.mxu1 %v1471_v10  ;;  %v1511_v23 = vld [vmem:[#allocation6 + $0x40] ss:$16 sps:$4 sm:$0xff]   ;;  %v1513_v24 = vld [vmem:[#allocation6 + $0x48] ss:$16 sps:$4 sm:$0xff]   ;;  %v1517_v25 = vld [vmem:[#allocation6 + $0x24] ss:$16 sps:$4 sm:$0xff]  }
  0x25   :  { %v1519_v26 = vld [vmem:[#allocation6 + $0x2c] ss:$16 sps:$4 sm:$0xff]   ;;  %v1523_v27 = vld [vmem:[#allocation6 + $0x20] ss:$16 sps:$4 sm:$0xff]   ;;  %v1525_v28 = vld [vmem:[#allocation6 + $0x28] ss:$16 sps:$4 sm:$0xff]  }
  0x26   :  { %v1529_v29 = vld [vmem:[#allocation6 + $0x4] ss:$16 sps:$4 sm:$0xff]   ;;  %v1531_v30 = vld [vmem:[#allocation6 + $0xc] ss:$16 sps:$4 sm:$0xff]   ;;  %v1535_v31 = vld [vmem:[#allocation6] ss:$16 sps:$4 sm:$0xff]  }
  0x27   :  { %249 = vmatpush1.bf16.msra.mxu0 %v1473_v11  ;;  %290 = vmatpush1.bf16.msra.mxu1 %v1475_v12  ;;  %v1537_v32 = vld [vmem:[#allocation6 + $0x8] ss:$16 sps:$4 sm:$0xff]   ;;  %v81_v34 = vld [vmem:[#allocation3] sm:$0xff]  ;;  %s1423_s0 = smov [#allocation8]  }
  0x28   :  { %250 = vmatprep.subr.bf16.mxu0 %v1479_v13  ;;  %291 = vmatprep.subr.bf16.mxu1 %v1483_v14  ;;  %v326_v35 = vunpack.c.l.bf16 %v81_v34  ;;  %v82_v36 = vld [vmem:[#allocation3 + $0x8] sm:$0xff]  ;;  %v327_v37 = vunpack.c.h.bf16 %v81_v34  ;;  %s1144_s1 = sshll.u32 %s1423_s0, 4  ;;  %s1145_s1 = int_to_ptr.vmem [resolvable:$true] %s1144_s1 }
  0x29   :  { %v329_v41 = vunpack.c.h.bf16 %v82_v36  ;;  %v328_v52 = vunpack.c.l.bf16 %v82_v36  ;;  %s1391_s21 = scalar_lea.vmem %s1145_s1, 128  ;;  %p1396_p11 = scmp.lt.s32.totalorder %s1145_s1, %s1145_s1 }
  0x2a   :  { %p1392_p10 = scmp.ne.s32.totalorder %s1145_s1, %s1391_s21  ;;  %p1397_p12 = scmp.lt.s32.totalorder %s1391_s21, %s1391_s21 }
  0x2b   :  { %251 = vmatpush1.bf16.msra.mxu0 %v1485_v15  ;;  %292 = vmatpush1.bf16.msra.mxu1 %v1489_v16 }
  0x2c   :  { %252 = vmatprep.subr.bf16.mxu0 %v1491_v17  ;;  %293 = vmatprep.subr.bf16.mxu1 %v1495_v18  ;;  %p1398_p13 = por %p1397_p12, %p1396_p11 }
  0x2e   :  { %p1399_p0 = pnand %p1398_p13, %p1392_p10 }
  0x2f   :  { %253 = vmatpush1.bf16.msra.mxu0 %v1497_v19  ;;  %294 = vmatpush1.bf16.msra.mxu1 %v1499_v20 }
  0x30   :  { %254 = vmatprep.subr.bf16.mxu0 %v1503_v21  ;;  %295 = vmatprep.subr.bf16.mxu1 %v1507_v22 }
  0x33   :  { %255 = vmatpush1.bf16.msra.mxu0 %v1511_v23  ;;  %296 = vmatpush1.bf16.msra.mxu1 %v1513_v24 }
  0x34   :  { %256 = vmatprep.subr.bf16.mxu0 %v1517_v25  ;;  %297 = vmatprep.subr.bf16.mxu1 %v1519_v26 }
  0x37   :  { %257 = vmatpush1.bf16.msra.mxu0 %v1523_v27  ;;  %298 = vmatpush1.bf16.msra.mxu1 %v1525_v28 }
  0x38   :  { %258 = vmatprep.subr.bf16.mxu0 %v1529_v29  ;;  %299 = vmatprep.subr.bf16.mxu1 %v1531_v30 }
  0x3b   :  { %259 = vmatpush1.bf16.msra.mxu0 %v1535_v31  ;;  %300 = vmatpush1.bf16.msra.mxu1 %v1537_v32 }
  0x3c   :  { %356 = vmatprep.subr.bf16.mxu0 %v1447_v1  ;;  %397 = vmatprep.subr.bf16.mxu1 %v1449_v2 }
  0x3e   :  { %277 = vmatmul.mubr.bf16.vlgmr.msra.gmra.mxu0 %v1422_v33  ;;  %318 = vmatmul.mubr.bf16.vlgmr.msra.gmra.mxu1 %v1422_v33 }
  0x3f   :  { %357 = vmatpush1.bf16.msra.mxu0 %v1452_v3  ;;  %398 = vmatpush1.bf16.msra.mxu1 %v1454_v4 }
  0x40   :  { %358 = vmatprep.subr.bf16.mxu0 %v1457_v5  ;;  %399 = vmatprep.subr.bf16.mxu1 %v1461_v6 }
  0x41   :  { %388 = vmatprep.mubr.bf16.mxu0 %v1421_v0  ;;  %429 = vmatprep.mubr.bf16.mxu1 %v1421_v0 }
  0x43   :  { %359 = vmatpush1.bf16.msra.mxu0 %v1463_v7  ;;  %400 = vmatpush1.bf16.msra.mxu1 %v1466_v8 }
  0x44   :  { %360 = vmatprep.subr.bf16.mxu0 %v1469_v9  ;;  %401 = vmatprep.subr.bf16.mxu1 %v1471_v10 }
  0x47   :  { %361 = vmatpush1.bf16.msra.mxu0 %v1473_v11  ;;  %402 = vmatpush1.bf16.msra.mxu1 %v1475_v12 }
  0x48   :  { %362 = vmatprep.subr.bf16.mxu0 %v1479_v13  ;;  %403 = vmatprep.subr.bf16.mxu1 %v1483_v14 }
  0x4b   :  { %363 = vmatpush1.bf16.msra.mxu0 %v1485_v15  ;;  %404 = vmatpush1.bf16.msra.mxu1 %v1489_v16 }
  0x4c   :  { %364 = vmatprep.subr.bf16.mxu0 %v1491_v17  ;;  %405 = vmatprep.subr.bf16.mxu1 %v1495_v18 }
  0x4f   :  { %365 = vmatpush1.bf16.msra.mxu0 %v1497_v19  ;;  %406 = vmatpush1.bf16.msra.mxu1 %v1499_v20 }
  0x50   :  { %366 = vmatprep.subr.bf16.mxu0 %v1503_v21  ;;  %407 = vmatprep.subr.bf16.mxu1 %v1507_v22 }
  0x53   :  { %367 = vmatpush1.bf16.msra.mxu0 %v1511_v23  ;;  %408 = vmatpush1.bf16.msra.mxu1 %v1513_v24 }
  0x54   :  { %368 = vmatprep.subr.bf16.mxu0 %v1517_v25  ;;  %409 = vmatprep.subr.bf16.mxu1 %v1519_v26 }
  0x57   :  { %369 = vmatpush1.bf16.msra.mxu0 %v1523_v27  ;;  %410 = vmatpush1.bf16.msra.mxu1 %v1525_v28 }
  0x58   :  { %370 = vmatprep.subr.bf16.mxu0 %v1529_v29  ;;  %411 = vmatprep.subr.bf16.mxu1 %v1531_v30 }
  0x5b   :  { %371 = vmatpush1.bf16.msra.mxu0 %v1535_v31  ;;  %412 = vmatpush1.bf16.msra.mxu1 %v1537_v32 }
  0x5c   :  { %468 = vmatprep.subr.bf16.mxu0 %v1447_v1  ;;  %509 = vmatprep.subr.bf16.mxu1 %v1449_v2 }
  0xfe   :  { %v278_v38 = vpop.f32.mrf.mxu0  ;;  %v319_v39 = vpop.f32.mrf.mxu1 }
  0xff   :  { %v330_v40 = vadd.f32 %v326_v35, %v278_v38  ;;  %v332_v53 = vadd.f32 %v328_v52, %v319_v39 }
 0x100   :  { %v280_v42 = vpop.f32.mrf.mxu0  ;;  %v321_v43 = vpop.f32.mrf.mxu1 }
 0x101   :  { %v334_v44 = vmul.f32 0.5, %v330_v40  ;;  %v331_v45 = vadd.f32 %v327_v37, %v280_v42  ;;  %v333_v49 = vadd.f32 %v329_v41, %v321_v43  ;;  %v336_v54 = vmul.f32 0.5, %v332_v53  ;;  %v353_v40 = vld [vmem:[#allocation3 + $0x10] sm:$0xff] }
 0x102   :  { %v282_v46 = vpop.f32.mrf.mxu0  ;;  %v323_v47 = vpop.f32.mrf.mxu1  ;;  %v438_v41 = vunpack.c.l.bf16 %v353_v40  ;;  %v439_v42 = vunpack.c.h.bf16 %v353_v40 }
 0x103   :  { %1241 = vtanh.f32 %v334_v44  ;;  %v335_v48 = vmul.f32 0.5, %v331_v45  ;;  %v354_v46 = vld [vmem:[#allocation3 + $0x18] sm:$0xff] }
 0x104   :  { %v283_v50 = vpop.f32.mrf.mxu0  ;;  %v324_v51 = vpop.f32.mrf.mxu1 }
 0x105   :  { %1243 = vtanh.f32 %v335_v48  ;;  %v441_v51 = vunpack.c.h.bf16 %v354_v46 }
 0x106   :  { %1245 = vtanh.f32 %v333_v49 }
 0x107   :  { %1247 = vtanh.f32 %v336_v54 }
 0x110   :  { %v1242_v55 = vpop.eup %1241 }
 0x111   :  { %v340_v56 = vmul.f32 0.5, %v1242_v55 }
 0x112   :  { %v1244_v57 = vpop.eup %1243 }
 0x113   :  { %v343_v58 = vadd.f32 0.5, %v340_v56  ;;  %v341_v59 = vmul.f32 0.5, %v1244_v57  ;;  %v1246_v60 = vpop.eup %1245 }
 0x114   :  { %v1248_v34 = vpop.eup %1247 }
 0x115   :  { %v344_v61 = vadd.f32 0.5, %v341_v59  ;;  %v348_v63 = vmul.f32 %v1246_v60, %v343_v58  ;;  %v342_v35 = vmul.f32 0.5, %v1248_v34  ;;  %v440_v58 = vunpack.c.l.bf16 %v354_v46 }
 0x117   :  { %v347_v62 = vmul.f32 0.0, %v344_v61  ;;  %v345_v36 = vadd.f32 0.5, %v342_v35 }
 0x119   :  { %v1579_v33 = vadd.f32 %v348_v63, %v347_v62 }
 0x11b   :  { %1249 = vtanh.f32 %v1579_v33 }
 0x128   :  { %v1250_v37 = vpop.eup %1249 }
 0x129   :  { %v351_v38 = vmul.f32 %v1250_v37, %v345_v36 }
 0x12b   :  { %v355_v39 = vpack.c.bf16 %v351_v38, %v351_v38 }
 0x12d   :  { %389 = vmatmul.mubr.bf16.vlgmr.msra.gmra.mxu0 %v355_v39  ;;  %430 = vmatmul.mubr.bf16.vlgmr.msra.gmra.mxu1 %v355_v39 }
 0x12e   :  { %469 = vmatpush1.bf16.msra.mxu0 %v1452_v3  ;;  %510 = vmatpush1.bf16.msra.mxu1 %v1454_v4 }
 0x12f   :  { %470 = vmatprep.subr.bf16.mxu0 %v1457_v5  ;;  %511 = vmatprep.subr.bf16.mxu1 %v1461_v6 }
 0x130   :  { %500 = vmatprep.mubr.bf16.mxu0 %v1421_v0  ;;  %541 = vmatprep.mubr.bf16.mxu1 %v1421_v0 }
 0x132   :  { %471 = vmatpush1.bf16.msra.mxu0 %v1463_v7  ;;  %512 = vmatpush1.bf16.msra.mxu1 %v1466_v8 }
 0x133   :  { %472 = vmatprep.subr.bf16.mxu0 %v1469_v9  ;;  %513 = vmatprep.subr.bf16.mxu1 %v1471_v10 }
 0x136   :  { %473 = vmatpush1.bf16.msra.mxu0 %v1473_v11  ;;  %514 = vmatpush1.bf16.msra.mxu1 %v1475_v12 }
 0x137   :  { %474 = vmatprep.subr.bf16.mxu0 %v1479_v13  ;;  %515 = vmatprep.subr.bf16.mxu1 %v1483_v14 }
 0x13a   :  { %475 = vmatpush1.bf16.msra.mxu0 %v1485_v15  ;;  %516 = vmatpush1.bf16.msra.mxu1 %v1489_v16 }
 0x13b   :  { %476 = vmatprep.subr.bf16.mxu0 %v1491_v17  ;;  %517 = vmatprep.subr.bf16.mxu1 %v1495_v18 }
 0x13e   :  { %477 = vmatpush1.bf16.msra.mxu0 %v1497_v19  ;;  %518 = vmatpush1.bf16.msra.mxu1 %v1499_v20 }
 0x13f   :  { %478 = vmatprep.subr.bf16.mxu0 %v1503_v21  ;;  %519 = vmatprep.subr.bf16.mxu1 %v1507_v22 }
 0x142   :  { %479 = vmatpush1.bf16.msra.mxu0 %v1511_v23  ;;  %520 = vmatpush1.bf16.msra.mxu1 %v1513_v24 }
 0x143   :  { %480 = vmatprep.subr.bf16.mxu0 %v1517_v25  ;;  %521 = vmatprep.subr.bf16.mxu1 %v1519_v26 }
 0x146   :  { %481 = vmatpush1.bf16.msra.mxu0 %v1523_v27  ;;  %522 = vmatpush1.bf16.msra.mxu1 %v1525_v28 }
 0x147   :  { %482 = vmatprep.subr.bf16.mxu0 %v1529_v29  ;;  %523 = vmatprep.subr.bf16.mxu1 %v1531_v30 }
 0x14a   :  { %483 = vmatpush1.bf16.msra.mxu0 %v1535_v31  ;;  %524 = vmatpush1.bf16.msra.mxu1 %v1537_v32 }
 0x14b   :  { %580 = vmatprep.subr.bf16.mxu0 %v1447_v1  ;;  %621 = vmatprep.subr.bf16.mxu1 %v1449_v2 }
 0x1ed   :  { %v390_v43 = vpop.f32.mrf.mxu0  ;;  %v431_v44 = vpop.f32.mrf.mxu1 }
 0x1ee   :  { %v442_v45 = vadd.f32 %v438_v41, %v390_v43  ;;  %v444_v59 = vadd.f32 %v440_v58, %v431_v44 }
 0x1ef   :  { %v392_v47 = vpop.f32.mrf.mxu0  ;;  %v433_v48 = vpop.f32.mrf.mxu1 }
 0x1f0   :  { %v446_v49 = vmul.f32 0.5, %v442_v45  ;;  %v443_v50 = vadd.f32 %v439_v42, %v392_v47  ;;  %v445_v57 = vadd.f32 %v441_v51, %v433_v48  ;;  %v448_v60 = vmul.f32 0.5, %v444_v59 }
 0x1f1   :  { %v394_v52 = vpop.f32.mrf.mxu0  ;;  %v435_v53 = vpop.f32.mrf.mxu1 }
 0x1f2   :  { %1251 = vtanh.f32 %v446_v49  ;;  %v447_v54 = vmul.f32 0.5, %v443_v50  ;;  %v466_v52 = vld [vmem:[#allocation3 + $0x28] sm:$0xff] }
 0x1f3   :  { %v395_v55 = vpop.f32.mrf.mxu0  ;;  %v436_v56 = vpop.f32.mrf.mxu1 }
 0x1f4   :  { %1253 = vtanh.f32 %v447_v54 }
 0x1f5   :  { %1255 = vtanh.f32 %v445_v57  ;;  %v553_v57 = vunpack.c.h.bf16 %v466_v52 }
 0x1f6   :  { %1257 = vtanh.f32 %v448_v60 }
 0x1ff   :  { %v1252_v61 = vpop.eup %1251 }
 0x200   :  { %v452_v62 = vmul.f32 0.5, %v1252_v61 }
 0x201   :  { %v1254_v63 = vpop.eup %1253 }
 0x202   :  { %v455_v34 = vadd.f32 0.5, %v452_v62  ;;  %v453_v35 = vmul.f32 0.5, %v1254_v63  ;;  %v1256_v37 = vpop.eup %1255 }
 0x203   :  { %v1258_v41 = vpop.eup %1257 }
 0x204   :  { %v456_v36 = vadd.f32 0.5, %v453_v35  ;;  %v460_v39 = vmul.f32 %v1256_v37, %v455_v34  ;;  %v454_v42 = vmul.f32 0.5, %v1258_v41  ;;  %v552_v34 = vunpack.c.l.bf16 %v466_v52 }
 0x206   :  { %v459_v38 = vmul.f32 %v456_v36, %v1579_v33  ;;  %v457_v43 = vadd.f32 0.5, %v454_v42  ;;  %v465_v33 = vld [vmem:[#allocation3 + $0x20] sm:$0xff] }
 0x207   :  { %v550_v47 = vunpack.c.l.bf16 %v465_v33  ;;  %v551_v48 = vunpack.c.h.bf16 %v465_v33 }
 0x208   :  { %v1617_v40 = vadd.f32 %v460_v39, %v459_v38 }
 0x20a   :  { %1259 = vtanh.f32 %v1617_v40 }
 0x217   :  { %v1260_v44 = vpop.eup %1259 }
 0x218   :  { %v463_v45 = vmul.f32 %v1260_v44, %v457_v43 }
 0x21a   :  { %v467_v46 = vpack.c.bf16 %v463_v45, %v463_v45 }
 0x21c   :  { %501 = vmatmul.mubr.bf16.vlgmr.msra.gmra.mxu0 %v467_v46  ;;  %542 = vmatmul.mubr.bf16.vlgmr.msra.gmra.mxu1 %v467_v46 }
 0x21d   :  { %581 = vmatpush1.bf16.msra.mxu0 %v1452_v3  ;;  %622 = vmatpush1.bf16.msra.mxu1 %v1454_v4 }
 0x21e   :  { %582 = vmatprep.subr.bf16.mxu0 %v1457_v5  ;;  %623 = vmatprep.subr.bf16.mxu1 %v1461_v6 }
 0x21f   :  { %612 = vmatprep.mubr.bf16.mxu0 %v1421_v0  ;;  %653 = vmatprep.mubr.bf16.mxu1 %v1421_v0 }
 0x221   :  { %583 = vmatpush1.bf16.msra.mxu0 %v1463_v7  ;;  %624 = vmatpush1.bf16.msra.mxu1 %v1466_v8 }
 0x222   :  { %584 = vmatprep.subr.bf16.mxu0 %v1469_v9  ;;  %625 = vmatprep.subr.bf16.mxu1 %v1471_v10 }
 0x225   :  { %585 = vmatpush1.bf16.msra.mxu0 %v1473_v11  ;;  %626 = vmatpush1.bf16.msra.mxu1 %v1475_v12 }
 0x226   :  { %586 = vmatprep.subr.bf16.mxu0 %v1479_v13  ;;  %627 = vmatprep.subr.bf16.mxu1 %v1483_v14 }
 0x229   :  { %587 = vmatpush1.bf16.msra.mxu0 %v1485_v15  ;;  %628 = vmatpush1.bf16.msra.mxu1 %v1489_v16 }
 0x22a   :  { %588 = vmatprep.subr.bf16.mxu0 %v1491_v17  ;;  %629 = vmatprep.subr.bf16.mxu1 %v1495_v18 }
 0x22d   :  { %589 = vmatpush1.bf16.msra.mxu0 %v1497_v19  ;;  %630 = vmatpush1.bf16.msra.mxu1 %v1499_v20 }
 0x22e   :  { %590 = vmatprep.subr.bf16.mxu0 %v1503_v21  ;;  %631 = vmatprep.subr.bf16.mxu1 %v1507_v22 }
 0x231   :  { %591 = vmatpush1.bf16.msra.mxu0 %v1511_v23  ;;  %632 = vmatpush1.bf16.msra.mxu1 %v1513_v24 }
 0x232   :  { %592 = vmatprep.subr.bf16.mxu0 %v1517_v25  ;;  %633 = vmatprep.subr.bf16.mxu1 %v1519_v26 }
 0x235   :  { %593 = vmatpush1.bf16.msra.mxu0 %v1523_v27  ;;  %634 = vmatpush1.bf16.msra.mxu1 %v1525_v28 }
 0x236   :  { %594 = vmatprep.subr.bf16.mxu0 %v1529_v29  ;;  %635 = vmatprep.subr.bf16.mxu1 %v1531_v30 }
 0x239   :  { %595 = vmatpush1.bf16.msra.mxu0 %v1535_v31  ;;  %636 = vmatpush1.bf16.msra.mxu1 %v1537_v32 }
 0x23a   :  { %692 = vmatprep.subr.bf16.mxu0 %v1447_v1  ;;  %733 = vmatprep.subr.bf16.mxu1 %v1449_v2 }
 0x2dc   :  { %v502_v49 = vpop.f32.mrf.mxu0  ;;  %v543_v50 = vpop.f32.mrf.mxu1 }
 0x2dd   :  { %v554_v51 = vadd.f32 %v550_v47, %v502_v49  ;;  %v556_v35 = vadd.f32 %v552_v34, %v543_v50 }
 0x2de   :  { %v504_v53 = vpop.f32.mrf.mxu0  ;;  %v545_v54 = vpop.f32.mrf.mxu1 }
 0x2df   :  { %v558_v55 = vmul.f32 0.5, %v554_v51  ;;  %v555_v56 = vadd.f32 %v551_v48, %v504_v53  ;;  %v557_v63 = vadd.f32 %v553_v57, %v545_v54  ;;  %v560_v36 = vmul.f32 0.5, %v556_v35 }
 0x2e0   :  { %v506_v58 = vpop.f32.mrf.mxu0  ;;  %v547_v59 = vpop.f32.mrf.mxu1 }
 0x2e1   :  { %1261 = vtanh.f32 %v558_v55  ;;  %v559_v60 = vmul.f32 0.5, %v555_v56  ;;  %v578_v58 = vld [vmem:[#allocation3 + $0x38] sm:$0xff] }
 0x2e2   :  { %v507_v61 = vpop.f32.mrf.mxu0  ;;  %v548_v62 = vpop.f32.mrf.mxu1 }
 0x2e3   :  { %1263 = vtanh.f32 %v559_v60 }
 0x2e4   :  { %1265 = vtanh.f32 %v557_v63  ;;  %v665_v63 = vunpack.c.h.bf16 %v578_v58 }
 0x2e5   :  { %1267 = vtanh.f32 %v560_v36 }
 0x2ee   :  { %v1262_v37 = vpop.eup %1261 }
 0x2ef   :  { %v564_v38 = vmul.f32 0.5, %v1262_v37 }
 0x2f0   :  { %v1264_v39 = vpop.eup %1263 }
 0x2f1   :  { %v567_v41 = vadd.f32 0.5, %v564_v38  ;;  %v565_v42 = vmul.f32 0.5, %v1264_v39  ;;  %v1266_v44 = vpop.eup %1265 }
 0x2f2   :  { %v1268_v47 = vpop.eup %1267 }
 0x2f3   :  { %v568_v43 = vadd.f32 0.5, %v565_v42  ;;  %v572_v46 = vmul.f32 %v1266_v44, %v567_v41  ;;  %v566_v48 = vmul.f32 0.5, %v1268_v47  ;;  %v664_v41 = vunpack.c.l.bf16 %v578_v58 }
 0x2f5   :  { %v571_v45 = vmul.f32 %v568_v43, %v1617_v40  ;;  %v569_v49 = vadd.f32 0.5, %v566_v48  ;;  %v577_v40 = vld [vmem:[#allocation3 + $0x30] sm:$0xff] }
 0x2f6   :  { %v662_v53 = vunpack.c.l.bf16 %v577_v40  ;;  %v663_v54 = vunpack.c.h.bf16 %v577_v40 }
 0x2f7   :  { %v1655_v33 = vadd.f32 %v572_v46, %v571_v45 }
 0x2f9   :  { %1269 = vtanh.f32 %v1655_v33 }
 0x306   :  { %v1270_v50 = vpop.eup %1269 }
 0x307   :  { %v575_v51 = vmul.f32 %v1270_v50, %v569_v49 }
 0x309   :  { %v579_v52 = vpack.c.bf16 %v575_v51, %v575_v51 }
 0x30b   :  { %613 = vmatmul.mubr.bf16.vlgmr.msra.gmra.mxu0 %v579_v52  ;;  %654 = vmatmul.mubr.bf16.vlgmr.msra.gmra.mxu1 %v579_v52 }
 0x30c   :  { %693 = vmatpush1.bf16.msra.mxu0 %v1452_v3  ;;  %734 = vmatpush1.bf16.msra.mxu1 %v1454_v4 }
 0x30d   :  { %694 = vmatprep.subr.bf16.mxu0 %v1457_v5  ;;  %735 = vmatprep.subr.bf16.mxu1 %v1461_v6 }
 0x30e   :  { %724 = vmatprep.mubr.bf16.mxu0 %v1421_v0  ;;  %765 = vmatprep.mubr.bf16.mxu1 %v1421_v0 }
 0x310   :  { %695 = vmatpush1.bf16.msra.mxu0 %v1463_v7  ;;  %736 = vmatpush1.bf16.msra.mxu1 %v1466_v8 }
 0x311   :  { %696 = vmatprep.subr.bf16.mxu0 %v1469_v9  ;;  %737 = vmatprep.subr.bf16.mxu1 %v1471_v10 }
 0x314   :  { %697 = vmatpush1.bf16.msra.mxu0 %v1473_v11  ;;  %738 = vmatpush1.bf16.msra.mxu1 %v1475_v12 }
 0x315   :  { %698 = vmatprep.subr.bf16.mxu0 %v1479_v13  ;;  %739 = vmatprep.subr.bf16.mxu1 %v1483_v14 }
 0x318   :  { %699 = vmatpush1.bf16.msra.mxu0 %v1485_v15  ;;  %740 = vmatpush1.bf16.msra.mxu1 %v1489_v16 }
 0x319   :  { %700 = vmatprep.subr.bf16.mxu0 %v1491_v17  ;;  %741 = vmatprep.subr.bf16.mxu1 %v1495_v18 }
 0x31c   :  { %701 = vmatpush1.bf16.msra.mxu0 %v1497_v19  ;;  %742 = vmatpush1.bf16.msra.mxu1 %v1499_v20 }
 0x31d   :  { %702 = vmatprep.subr.bf16.mxu0 %v1503_v21  ;;  %743 = vmatprep.subr.bf16.mxu1 %v1507_v22 }
 0x320   :  { %703 = vmatpush1.bf16.msra.mxu0 %v1511_v23  ;;  %744 = vmatpush1.bf16.msra.mxu1 %v1513_v24 }
 0x321   :  { %704 = vmatprep.subr.bf16.mxu0 %v1517_v25  ;;  %745 = vmatprep.subr.bf16.mxu1 %v1519_v26 }
 0x324   :  { %705 = vmatpush1.bf16.msra.mxu0 %v1523_v27  ;;  %746 = vmatpush1.bf16.msra.mxu1 %v1525_v28 }
 0x325   :  { %706 = vmatprep.subr.bf16.mxu0 %v1529_v29  ;;  %747 = vmatprep.subr.bf16.mxu1 %v1531_v30 }
 0x328   :  { %707 = vmatpush1.bf16.msra.mxu0 %v1535_v31  ;;  %748 = vmatpush1.bf16.msra.mxu1 %v1537_v32 }
 0x329   :  { %804 = vmatprep.subr.bf16.mxu0 %v1447_v1  ;;  %845 = vmatprep.subr.bf16.mxu1 %v1449_v2 }
 0x3cb   :  { %v614_v55 = vpop.f32.mrf.mxu0  ;;  %v655_v56 = vpop.f32.mrf.mxu1 }
 0x3cc   :  { %v666_v57 = vadd.f32 %v662_v53, %v614_v55  ;;  %v668_v42 = vadd.f32 %v664_v41, %v655_v56 }
 0x3cd   :  { %v616_v59 = vpop.f32.mrf.mxu0  ;;  %v657_v60 = vpop.f32.mrf.mxu1 }
 0x3ce   :  { %v670_v61 = vmul.f32 0.5, %v666_v57  ;;  %v667_v62 = vadd.f32 %v663_v54, %v616_v59  ;;  %v669_v39 = vadd.f32 %v665_v63, %v657_v60  ;;  %v672_v43 = vmul.f32 0.5, %v668_v42 }
 0x3cf   :  { %v618_v34 = vpop.f32.mrf.mxu0  ;;  %v659_v35 = vpop.f32.mrf.mxu1 }
 0x3d0   :  { %1271 = vtanh.f32 %v670_v61  ;;  %v671_v36 = vmul.f32 0.5, %v667_v62  ;;  %v690_v34 = vld [vmem:[#allocation3 + $0x48] sm:$0xff] }
 0x3d1   :  { %v619_v37 = vpop.f32.mrf.mxu0  ;;  %v660_v38 = vpop.f32.mrf.mxu1 }
 0x3d2   :  { %1273 = vtanh.f32 %v671_v36 }
 0x3d3   :  { %1275 = vtanh.f32 %v669_v39  ;;  %v777_v39 = vunpack.c.h.bf16 %v690_v34 }
 0x3d4   :  { %1277 = vtanh.f32 %v672_v43 }
 0x3dd   :  { %v1272_v44 = vpop.eup %1271 }
 0x3de   :  { %v676_v45 = vmul.f32 0.5, %v1272_v44 }
 0x3df   :  { %v1274_v46 = vpop.eup %1273 }
 0x3e0   :  { %v679_v47 = vadd.f32 0.5, %v676_v45  ;;  %v677_v48 = vmul.f32 0.5, %v1274_v46  ;;  %v1276_v50 = vpop.eup %1275  ;;  %v776_v45 = vunpack.c.l.bf16 %v690_v34 }
 0x3e1   :  { %v1278_v53 = vpop.eup %1277 }
 0x3e2   :  { %v680_v49 = vadd.f32 0.5, %v677_v48  ;;  %v684_v52 = vmul.f32 %v1276_v50, %v679_v47  ;;  %v678_v54 = vmul.f32 0.5, %v1278_v53 }
 0x3e4   :  { %v683_v51 = vmul.f32 %v680_v49, %v1655_v33  ;;  %v681_v55 = vadd.f32 0.5, %v678_v54  ;;  %v689_v33 = vld [vmem:[#allocation3 + $0x40] sm:$0xff] }
 0x3e5   :  { %v774_v59 = vunpack.c.l.bf16 %v689_v33  ;;  %v775_v60 = vunpack.c.h.bf16 %v689_v33 }
 0x3e6   :  { %v1693_v40 = vadd.f32 %v684_v52, %v683_v51 }
 0x3e8   :  { %1279 = vtanh.f32 %v1693_v40 }
 0x3f5   :  { %v1280_v56 = vpop.eup %1279 }
 0x3f6   :  { %v687_v57 = vmul.f32 %v1280_v56, %v681_v55 }
 0x3f8   :  { %v691_v58 = vpack.c.bf16 %v687_v57, %v687_v57 }
 0x3fa   :  { %725 = vmatmul.mubr.bf16.vlgmr.msra.gmra.mxu0 %v691_v58  ;;  %766 = vmatmul.mubr.bf16.vlgmr.msra.gmra.mxu1 %v691_v58 }
 0x3fb   :  { %805 = vmatpush1.bf16.msra.mxu0 %v1452_v3  ;;  %846 = vmatpush1.bf16.msra.mxu1 %v1454_v4 }
 0x3fc   :  { %806 = vmatprep.subr.bf16.mxu0 %v1457_v5  ;;  %847 = vmatprep.subr.bf16.mxu1 %v1461_v6 }
 0x3fd   :  { %836 = vmatprep.mubr.bf16.mxu0 %v1421_v0  ;;  %877 = vmatprep.mubr.bf16.mxu1 %v1421_v0 }
 0x3ff   :  { %807 = vmatpush1.bf16.msra.mxu0 %v1463_v7  ;;  %848 = vmatpush1.bf16.msra.mxu1 %v1466_v8 }
 0x400   :  { %808 = vmatprep.subr.bf16.mxu0 %v1469_v9  ;;  %849 = vmatprep.subr.bf16.mxu1 %v1471_v10 }
 0x403   :  { %809 = vmatpush1.bf16.msra.mxu0 %v1473_v11  ;;  %850 = vmatpush1.bf16.msra.mxu1 %v1475_v12 }
 0x404   :  { %810 = vmatprep.subr.bf16.mxu0 %v1479_v13  ;;  %851 = vmatprep.subr.bf16.mxu1 %v1483_v14 }
 0x407   :  { %811 = vmatpush1.bf16.msra.mxu0 %v1485_v15  ;;  %852 = vmatpush1.bf16.msra.mxu1 %v1489_v16 }
 0x408   :  { %812 = vmatprep.subr.bf16.mxu0 %v1491_v17  ;;  %853 = vmatprep.subr.bf16.mxu1 %v1495_v18 }
 0x40b   :  { %813 = vmatpush1.bf16.msra.mxu0 %v1497_v19  ;;  %854 = vmatpush1.bf16.msra.mxu1 %v1499_v20 }
 0x40c   :  { %814 = vmatprep.subr.bf16.mxu0 %v1503_v21  ;;  %855 = vmatprep.subr.bf16.mxu1 %v1507_v22 }
 0x40f   :  { %815 = vmatpush1.bf16.msra.mxu0 %v1511_v23  ;;  %856 = vmatpush1.bf16.msra.mxu1 %v1513_v24 }
 0x410   :  { %816 = vmatprep.subr.bf16.mxu0 %v1517_v25  ;;  %857 = vmatprep.subr.bf16.mxu1 %v1519_v26 }
 0x413   :  { %817 = vmatpush1.bf16.msra.mxu0 %v1523_v27  ;;  %858 = vmatpush1.bf16.msra.mxu1 %v1525_v28 }
 0x414   :  { %818 = vmatprep.subr.bf16.mxu0 %v1529_v29  ;;  %859 = vmatprep.subr.bf16.mxu1 %v1531_v30 }
 0x417   :  { %819 = vmatpush1.bf16.msra.mxu0 %v1535_v31  ;;  %860 = vmatpush1.bf16.msra.mxu1 %v1537_v32 }
 0x418   :  { %916 = vmatprep.subr.bf16.mxu0 %v1447_v1  ;;  %957 = vmatprep.subr.bf16.mxu1 %v1449_v2 }
 0x4ba   :  { %v726_v61 = vpop.f32.mrf.mxu0  ;;  %v767_v62 = vpop.f32.mrf.mxu1 }
 0x4bb   :  { %v778_v63 = vadd.f32 %v774_v59, %v726_v61  ;;  %v780_v46 = vadd.f32 %v776_v45, %v767_v62  ;;  %v1326_v45 = vld [vmem:[#allocation6 + $0xcc] ss:$16 sps:$4 sm:$0xff]  }
 0x4bc   :  { %v728_v35 = vpop.f32.mrf.mxu0  ;;  %v769_v36 = vpop.f32.mrf.mxu1 }
 0x4bd   :  { %v782_v37 = vmul.f32 0.5, %v778_v63  ;;  %v779_v38 = vadd.f32 %v775_v60, %v728_v35  ;;  %v781_v2 = vadd.f32 %v777_v39, %v769_v36  ;;  %v784_v47 = vmul.f32 0.5, %v780_v46  ;;  %v1327_v46 = vld [vmem:[#allocation6 + $0xc0] ss:$16 sps:$4 sm:$0xff]  }
 0x4be   :  { %v730_v41 = vpop.f32.mrf.mxu0  ;;  %v771_v42 = vpop.f32.mrf.mxu1 }
 0x4bf   :  { %1281 = vtanh.f32 %v782_v37  ;;  %v783_v43 = vmul.f32 0.5, %v779_v38 }
 0x4c0   :  { %v731_v44 = vpop.f32.mrf.mxu0  ;;  %v772_v1 = vpop.f32.mrf.mxu1 }
 0x4c1   :  { %1283 = vtanh.f32 %v783_v43  ;;  %v1323_v44 = vld [vmem:[#allocation6 + $0xe0] ss:$16 sps:$4 sm:$0xff]   ;;  %v1324_v1 = vld [vmem:[#allocation6 + $0xe8] ss:$16 sps:$4 sm:$0xff]  }
 0x4c2   :  { %1285 = vtanh.f32 %v781_v2  ;;  %v1325_v2 = vld [vmem:[#allocation6 + $0xc4] ss:$16 sps:$4 sm:$0xff]  }
 0x4c3   :  { %1287 = vtanh.f32 %v784_v47  ;;  %v1328_v47 = vld [vmem:[#allocation6 + $0xc8] ss:$16 sps:$4 sm:$0xff]  }
 0x4cc   :  { %v1282_v48 = vpop.eup %1281 }
 0x4cd   :  { %v788_v49 = vmul.f32 0.5, %v1282_v48  ;;  %v1329_v48 = vld [vmem:[#allocation6 + $0xa4] ss:$16 sps:$4 sm:$0xff]  }
 0x4ce   :  { %v1284_v50 = vpop.eup %1283 }
 0x4cf   :  { %v791_v51 = vadd.f32 0.5, %v788_v49  ;;  %v789_v52 = vmul.f32 0.5, %v1284_v50  ;;  %v1286_v54 = vpop.eup %1285  ;;  %v1330_v49 = vld [vmem:[#allocation6 + $0xac] ss:$16 sps:$4 sm:$0xff]   ;;  %v1331_v50 = vld [vmem:[#allocation6 + $0xa0] ss:$16 sps:$4 sm:$0xff]  }
 0x4d0   :  { %v1288_v58 = vpop.eup %1287 }
 0x4d1   :  { %v792_v53 = vadd.f32 0.5, %v789_v52  ;;  %v796_v56 = vmul.f32 %v1286_v54, %v791_v51  ;;  %v790_v33 = vmul.f32 0.5, %v1288_v58  ;;  %v1332_v51 = vld [vmem:[#allocation6 + $0xa8] ss:$16 sps:$4 sm:$0xff]   ;;  %v1333_v52 = vld [vmem:[#allocation6 + $0x84] ss:$16 sps:$4 sm:$0xff]  }
 0x4d2   :  { %v1335_v54 = vld [vmem:[#allocation6 + $0x80] ss:$16 sps:$4 sm:$0xff]   ;;  %v1340_v58 = vld [vmem:[#allocation6 + $0x68] ss:$16 sps:$4 sm:$0xff]  }
 0x4d3   :  { %v795_v55 = vmul.f32 %v792_v53, %v1693_v40  ;;  %v793_v59 = vadd.f32 0.5, %v790_v33  ;;  %v1334_v53 = vld [vmem:[#allocation6 + $0x8c] ss:$16 sps:$4 sm:$0xff]   ;;  %v1341_v33 = vld [vmem:[#allocation6 + $0x44] ss:$16 sps:$4 sm:$0xff]  }
 0x4d5   :  { %v1731_v57 = vadd.f32 %v796_v56, %v795_v55  ;;  %v1336_v55 = vld [vmem:[#allocation6 + $0x88] ss:$16 sps:$4 sm:$0xff]   ;;  %v1338_v56 = vld [vmem:[#allocation6 + $0x6c] ss:$16 sps:$4 sm:$0xff]  }
 0x4d7   :  { %1289 = vtanh.f32 %v1731_v57 }
 0x4e4   :  { %v1290_v60 = vpop.eup %1289 }
 0x4e5   :  { %v799_v61 = vmul.f32 %v1290_v60, %v793_v59  ;;  %v1342_v59 = vld [vmem:[#allocation6 + $0x4c] ss:$16 sps:$4 sm:$0xff]   ;;  %v1343_v60 = vld [vmem:[#allocation6 + $0x40] ss:$16 sps:$4 sm:$0xff]  }
 0x4e7   :  { %v803_v62 = vpack.c.bf16 %v799_v61, %v799_v61  ;;  %v1344_v61 = vld [vmem:[#allocation6 + $0x48] ss:$16 sps:$4 sm:$0xff]  }
 0x4e9   :  { %837 = vmatmul.mubr.bf16.vlgmr.msra.gmra.mxu0 %v803_v62  ;;  %878 = vmatmul.mubr.bf16.vlgmr.msra.gmra.mxu1 %v803_v62  ;;  %v1345_v62 = vld [vmem:[#allocation6 + $0x24] ss:$16 sps:$4 sm:$0xff]  }
 0x4ea   :  { %917 = vmatpush1.bf16.msra.mxu0 %v1452_v3  ;;  %958 = vmatpush1.bf16.msra.mxu1 %v1454_v4  ;;  %v1321_v3 = vld [vmem:[#allocation6 + $0xe4] ss:$16 sps:$4 sm:$0xff]   ;;  %v1322_v4 = vld [vmem:[#allocation6 + $0xec] ss:$16 sps:$4 sm:$0xff]  }
 0x4eb   :  { %918 = vmatprep.subr.bf16.mxu0 %v1457_v5  ;;  %959 = vmatprep.subr.bf16.mxu1 %v1461_v6  ;;  %v801_v5 = vld [vmem:[#allocation3 + $0x50] sm:$0xff] }
 0x4ec   :  { %948 = vmatprep.mubr.bf16.mxu0 %v1421_v0  ;;  %989 = vmatprep.mubr.bf16.mxu1 %v1421_v0  ;;  %v886_v6 = vunpack.c.l.bf16 %v801_v5 }
 0x4ee   :  { %919 = vmatpush1.bf16.msra.mxu0 %v1463_v7  ;;  %960 = vmatpush1.bf16.msra.mxu1 %v1466_v8  ;;  %v887_v7 = vunpack.c.h.bf16 %v801_v5  ;;  %v1348_v5 = vld [vmem:[#allocation6 + $0x28] ss:$16 sps:$4 sm:$0xff]  }
 0x4ef   :  { %920 = vmatprep.subr.bf16.mxu0 %v1469_v9  ;;  %961 = vmatprep.subr.bf16.mxu1 %v1471_v10 }
 0x4f2   :  { %921 = vmatpush1.bf16.msra.mxu0 %v1473_v11  ;;  %962 = vmatpush1.bf16.msra.mxu1 %v1475_v12  ;;  %v802_v11 = vld [vmem:[#allocation3 + $0x58] sm:$0xff] }
 0x4f3   :  { %922 = vmatprep.subr.bf16.mxu0 %v1479_v13  ;;  %963 = vmatprep.subr.bf16.mxu1 %v1483_v14 }
 0x4f6   :  { %923 = vmatpush1.bf16.msra.mxu0 %v1485_v15  ;;  %964 = vmatpush1.bf16.msra.mxu1 %v1489_v16  ;;  %v889_v16 = vunpack.c.h.bf16 %v802_v11 }
 0x4f7   :  { %924 = vmatprep.subr.bf16.mxu0 %v1491_v17  ;;  %965 = vmatprep.subr.bf16.mxu1 %v1495_v18 }
 0x4fa   :  { %925 = vmatpush1.bf16.msra.mxu0 %v1497_v19  ;;  %966 = vmatpush1.bf16.msra.mxu1 %v1499_v20 }
 0x4fb   :  { %926 = vmatprep.subr.bf16.mxu0 %v1503_v21  ;;  %967 = vmatprep.subr.bf16.mxu1 %v1507_v22 }
 0x4fe   :  { %927 = vmatpush1.bf16.msra.mxu0 %v1511_v23  ;;  %968 = vmatpush1.bf16.msra.mxu1 %v1513_v24  ;;  %v888_v23 = vunpack.c.l.bf16 %v802_v11 }
 0x4ff   :  { %928 = vmatprep.subr.bf16.mxu0 %v1517_v25  ;;  %969 = vmatprep.subr.bf16.mxu1 %v1519_v26 }
 0x502   :  { %929 = vmatpush1.bf16.msra.mxu0 %v1523_v27  ;;  %970 = vmatpush1.bf16.msra.mxu1 %v1525_v28 }
 0x503   :  { %930 = vmatprep.subr.bf16.mxu0 %v1529_v29  ;;  %971 = vmatprep.subr.bf16.mxu1 %v1531_v30 }
 0x506   :  { %931 = vmatpush1.bf16.msra.mxu0 %v1535_v31  ;;  %972 = vmatpush1.bf16.msra.mxu1 %v1537_v32 }
 0x507   :  { %1028 = vmatprep.subr.bf16.mxu0 %v1321_v3  ;;  %1069 = vmatprep.subr.bf16.mxu1 %v1322_v4  ;;  %v1346_v3 = vld [vmem:[#allocation6 + $0x2c] ss:$16 sps:$4 sm:$0xff]   ;;  %v1347_v4 = vld [vmem:[#allocation6 + $0x20] ss:$16 sps:$4 sm:$0xff]  }
 0x5a9   :  { %v838_v8 = vpop.f32.mrf.mxu0  ;;  %v879_v9 = vpop.f32.mrf.mxu1 }
 0x5aa   :  { %v890_v10 = vadd.f32 %v886_v6, %v838_v8  ;;  %v892_v24 = vadd.f32 %v888_v23, %v879_v9  ;;  %v1349_v6 = vld [vmem:[#allocation6 + $0x4] ss:$16 sps:$4 sm:$0xff]  }
 0x5ab   :  { %v840_v12 = vpop.f32.mrf.mxu0  ;;  %v881_v13 = vpop.f32.mrf.mxu1  ;;  %v913_v8 = vld [vmem:[#allocation3 + $0x60] sm:$0xff] }
 0x5ac   :  { %v894_v14 = vmul.f32 0.5, %v890_v10  ;;  %v891_v15 = vadd.f32 %v887_v7, %v840_v12  ;;  %v893_v22 = vadd.f32 %v889_v16, %v881_v13  ;;  %v896_v25 = vmul.f32 0.5, %v892_v24  ;;  %v1350_v7 = vld [vmem:[#allocation6 + $0xc] ss:$16 sps:$4 sm:$0xff]  }
 0x5ad   :  { %v842_v17 = vpop.f32.mrf.mxu0  ;;  %v883_v18 = vpop.f32.mrf.mxu1  ;;  %v998_v9 = vunpack.c.l.bf16 %v913_v8  ;;  %v999_v10 = vunpack.c.h.bf16 %v913_v8 }
 0x5ae   :  { %1291 = vtanh.f32 %v894_v14  ;;  %v895_v19 = vmul.f32 0.5, %v891_v15  ;;  %v914_v14 = vld [vmem:[#allocation3 + $0x68] sm:$0xff] }
 0x5af   :  { %v843_v20 = vpop.f32.mrf.mxu0  ;;  %v884_v21 = vpop.f32.mrf.mxu1  ;;  %v1000_v24 = vunpack.c.l.bf16 %v914_v14 }
 0x5b0   :  { %1293 = vtanh.f32 %v895_v19  ;;  %v1001_v19 = vunpack.c.h.bf16 %v914_v14 }
 0x5b1   :  { %1295 = vtanh.f32 %v893_v22 }
 0x5b2   :  { %1297 = vtanh.f32 %v896_v25 }
 0x5bb   :  { %v1292_v26 = vpop.eup %1291 }
 0x5bc   :  { %v900_v27 = vmul.f32 0.5, %v1292_v26 }
 0x5bd   :  { %v1294_v28 = vpop.eup %1293 }
 0x5be   :  { %v903_v29 = vadd.f32 0.5, %v900_v27  ;;  %v901_v30 = vmul.f32 0.5, %v1294_v28  ;;  %v1296_v63 = vpop.eup %1295 }
 0x5bf   :  { %v1298_v37 = vpop.eup %1297 }
 0x5c0   :  { %v904_v40 = vadd.f32 0.5, %v901_v30  ;;  %v908_v35 = vmul.f32 %v1296_v63, %v903_v29  ;;  %v902_v38 = vmul.f32 0.5, %v1298_v37 }
 0x5c2   :  { %v907_v34 = vmul.f32 %v904_v40, %v1731_v57  ;;  %v905_v39 = vadd.f32 0.5, %v902_v38  ;;  %v1339_v57 = vld [vmem:[#allocation6 + $0x60] ss:$16 sps:$4 sm:$0xff]  }
 0x5c4   :  { %v1767_v36 = vadd.f32 %v908_v35, %v907_v34 }
 0x5c6   :  { %1299 = vtanh.f32 %v1767_v36 }
 0x5d3   :  { %v1300_v41 = vpop.eup %1299 }
 0x5d4   :  { %v911_v42 = vmul.f32 %v1300_v41, %v905_v39 }
 0x5d6   :  { %v915_v43 = vpack.c.bf16 %v911_v42, %v911_v42 }
 0x5d8   :  { %949 = vmatmul.mubr.bf16.vlgmr.msra.gmra.mxu0 %v915_v43  ;;  %990 = vmatmul.mubr.bf16.vlgmr.msra.gmra.mxu1 %v915_v43 }
 0x5d9   :  { %1029 = vmatpush1.bf16.msra.mxu0 %v1323_v44  ;;  %1070 = vmatpush1.bf16.msra.mxu1 %v1324_v1 }
 0x5da   :  { %1030 = vmatprep.subr.bf16.mxu0 %v1325_v2  ;;  %1071 = vmatprep.subr.bf16.mxu1 %v1326_v45  ;;  %v1025_v2 = vld [vmem:[#allocation3 + $0x70] sm:$0xff] }
 0x5db   :  { %1060 = vmatprep.mubr.bf16.mxu0 %v1421_v0  ;;  %1101 = vmatprep.mubr.bf16.mxu1 %v1421_v0  ;;  %v1337_v0 = vld [vmem:[#allocation6 + $0x64] ss:$16 sps:$4 sm:$0xff]   ;;  %v1110_v45 = vunpack.c.l.bf16 %v1025_v2 }
 0x5dd   :  { %1031 = vmatpush1.bf16.msra.mxu0 %v1327_v46  ;;  %1072 = vmatpush1.bf16.msra.mxu1 %v1328_v47  ;;  %v1111_v46 = vunpack.c.h.bf16 %v1025_v2 }
 0x5de   :  { %1032 = vmatprep.subr.bf16.mxu0 %v1329_v48  ;;  %1073 = vmatprep.subr.bf16.mxu1 %v1330_v49 }
 0x5e1   :  { %1033 = vmatpush1.bf16.msra.mxu0 %v1331_v50  ;;  %1074 = vmatpush1.bf16.msra.mxu1 %v1332_v51  ;;  %v1026_v50 = vld [vmem:[#allocation3 + $0x78] sm:$0xff] }
 0x5e2   :  { %1034 = vmatprep.subr.bf16.mxu0 %v1333_v52  ;;  %1075 = vmatprep.subr.bf16.mxu1 %v1334_v53 }
 0x5e5   :  { %1035 = vmatpush1.bf16.msra.mxu0 %v1335_v54  ;;  %1076 = vmatpush1.bf16.msra.mxu1 %v1336_v55  ;;  %v1113_v54 = vunpack.c.h.bf16 %v1026_v50 }
 0x5e6   :  { %1036 = vmatprep.subr.bf16.mxu0 %v1337_v0  ;;  %1077 = vmatprep.subr.bf16.mxu1 %v1338_v56 }
 0x5e9   :  { %1037 = vmatpush1.bf16.msra.mxu0 %v1339_v57  ;;  %1078 = vmatpush1.bf16.msra.mxu1 %v1340_v58 }
 0x5ea   :  { %1038 = vmatprep.subr.bf16.mxu0 %v1341_v33  ;;  %1079 = vmatprep.subr.bf16.mxu1 %v1342_v59  ;;  %v1112_v59 = vunpack.c.l.bf16 %v1026_v50 }
 0x5ed   :  { %1039 = vmatpush1.bf16.msra.mxu0 %v1343_v60  ;;  %1080 = vmatpush1.bf16.msra.mxu1 %v1344_v61 }
 0x5ee   :  { %1040 = vmatprep.subr.bf16.mxu0 %v1345_v62  ;;  %1081 = vmatprep.subr.bf16.mxu1 %v1346_v3 }
 0x5f1   :  { %1041 = vmatpush1.bf16.msra.mxu0 %v1347_v4  ;;  %1082 = vmatpush1.bf16.msra.mxu1 %v1348_v5 }
 0x5f2   :  { %1042 = vmatprep.subr.bf16.mxu0 %v1349_v6  ;;  %1083 = vmatprep.subr.bf16.mxu1 %v1350_v7 }
 0x5f5   :  { %1043 = vmatpush1.bf16.msra.mxu0 %v1535_v31  ;;  %1084 = vmatpush1.bf16.msra.mxu1 %v1537_v32 }
 0x698   :  { %v950_v11 = vpop.f32.mrf.mxu0  ;;  %v991_v12 = vpop.f32.mrf.mxu1 }
 0x699   :  { %v1002_v13 = vadd.f32 %v998_v9, %v950_v11  ;;  %v1004_v25 = vadd.f32 %v1000_v24, %v991_v12 }
 0x69a   :  { %v952_v15 = vpop.f32.mrf.mxu0  ;;  %v993_v16 = vpop.f32.mrf.mxu1 }
 0x69b   :  { %v1006_v17 = vmul.f32 0.5, %v1002_v13  ;;  %v1003_v18 = vadd.f32 %v999_v10, %v952_v15  ;;  %v1005_v32 = vadd.f32 %v1001_v19, %v993_v16  ;;  %v1008_v26 = vmul.f32 0.5, %v1004_v25 }
 0x69c   :  { %v954_v20 = vpop.f32.mrf.mxu0  ;;  %v995_v21 = vpop.f32.mrf.mxu1 }
 0x69d   :  { %1301 = vtanh.f32 %v1006_v17  ;;  %v1007_v22 = vmul.f32 0.5, %v1003_v18 }
 0x69e   :  { %v955_v23 = vpop.f32.mrf.mxu0  ;;  %v996_v31 = vpop.f32.mrf.mxu1 }
 0x69f   :  { %1303 = vtanh.f32 %v1007_v22 }
 0x6a0   :  { %1305 = vtanh.f32 %v1005_v32 }
 0x6a1   :  { %1307 = vtanh.f32 %v1008_v26 }
 0x6aa   :  { %v1302_v27 = vpop.eup %1301 }
 0x6ab   :  { %v1012_v28 = vmul.f32 0.5, %v1302_v27 }
 0x6ac   :  { %v1304_v29 = vpop.eup %1303 }
 0x6ad   :  { %v1015_v30 = vadd.f32 0.5, %v1012_v28  ;;  %v1013_v40 = vmul.f32 0.5, %v1304_v29  ;;  %v1306_v34 = vpop.eup %1305 }
 0x6ae   :  { %v1308_v39 = vpop.eup %1307 }
 0x6af   :  { %v1016_v63 = vadd.f32 0.5, %v1013_v40  ;;  %v1020_v37 = vmul.f32 %v1306_v34, %v1015_v30  ;;  %v1014_v41 = vmul.f32 0.5, %v1308_v39 }
 0x6b1   :  { %v1019_v35 = vmul.f32 %v1016_v63, %v1767_v36  ;;  %v1017_v42 = vadd.f32 0.5, %v1014_v41 }
 0x6b3   :  { %v1021_v38 = vadd.f32 %v1020_v37, %v1019_v35 }
 0x6b5   :  { %1309 = vtanh.f32 %v1021_v38 }
 0x6c2   :  { %v1310_v43 = vpop.eup %1309 }
 0x6c3   :  { %v1023_v44 = vmul.f32 %v1310_v43, %v1017_v42 }
 0x6c5   :  { %v1027_v1 = vpack.c.bf16 %v1023_v44, %v1023_v44 }
 0x6c7   :  { %1061 = vmatmul.mubr.bf16.vlgmr.msra.gmra.mxu0 %v1027_v1  ;;  %1102 = vmatmul.mubr.bf16.vlgmr.msra.gmra.mxu1 %v1027_v1 }
 0x787   :  { %v1062_v47 = vpop.f32.mrf.mxu0  ;;  %v1103_v48 = vpop.f32.mrf.mxu1 }
 0x788   :  { %v1114_v49 = vadd.f32 %v1110_v45, %v1062_v47  ;;  %v1116_v60 = vadd.f32 %v1112_v59, %v1103_v48 }
 0x789   :  { %v1064_v51 = vpop.f32.mrf.mxu0  ;;  %v1105_v36 = vpop.f32.mrf.mxu1 }
 0x78a   :  { %v1118_v52 = vmul.f32 0.5, %v1114_v49  ;;  %v1115_v53 = vadd.f32 %v1111_v46, %v1064_v51  ;;  %v1117_v33 = vadd.f32 %v1113_v54, %v1105_v36  ;;  %v1120_v61 = vmul.f32 0.5, %v1116_v60 }
 0x78b   :  { %v1066_v55 = vpop.f32.mrf.mxu0  ;;  %v1107_v0 = vpop.f32.mrf.mxu1 }
 0x78c   :  { %1311 = vtanh.f32 %v1118_v52  ;;  %v1119_v56 = vmul.f32 0.5, %v1115_v53 }
 0x78d   :  { %v1067_v57 = vpop.f32.mrf.mxu0  ;;  %v1108_v58 = vpop.f32.mrf.mxu1 }
 0x78e   :  { %1313 = vtanh.f32 %v1119_v56 }
 0x78f   :  { %1315 = vtanh.f32 %v1117_v33 }
 0x790   :  { %1317 = vtanh.f32 %v1120_v61 }
 0x799   :  { %v1312_v62 = vpop.eup %1311 }
 0x79a   :  { %v1124_v3 = vmul.f32 0.5, %v1312_v62 }
 0x79b   :  { %v1314_v4 = vpop.eup %1313 }
 0x79c   :  { %v1127_v5 = vadd.f32 0.5, %v1124_v3  ;;  %v1125_v6 = vmul.f32 0.5, %v1314_v4  ;;  %v1316_v8 = vpop.eup %1315 }
 0x79d   :  { %v1318_v12 = vpop.eup %1317 }
 0x79e   :  { %v1128_v7 = vadd.f32 0.5, %v1125_v6  ;;  %v1132_v10 = vmul.f32 %v1316_v8, %v1127_v5  ;;  %v1126_v13 = vmul.f32 0.5, %v1318_v12 }
 0x7a0   :  { %v1131_v9 = vmul.f32 %v1128_v7, %v1021_v38  ;;  %v1129_v14 = vadd.f32 0.5, %v1126_v13 }
 0x7a2   :  { %v1133_v11 = vadd.f32 %v1132_v10, %v1131_v9 }
 0x7a4   :  { %1319 = vtanh.f32 %v1133_v11 }
 0x7b1   :  { %v1320_v15 = vpop.eup %1319 }
 0x7b2   :  { %v1135_v16 = vmul.f32 %v1320_v15, %v1129_v14 }
 0x7b4   :  { %1136 = vst [vmem:[#allocation8] sm:$0xff] %v1135_v16 }
 0x7b5   :  { %1402 = shalt.err (!%p1399_p0)
}
 0x7b6   :  { %1147 = dma.vmem_to_hbm [thread:$0]  %s1145_s1, 128, %s1780_s2, [#allocation5]  }
 0x7b7   :  { %1415 = dma.done.wait [#allocation5], 128  }
 0x7b8   :  { %1416 = vsyncadd [#allocation5], 4294967168 }
 0x7b9   :  { %1151 = vsyncpa [#allocation4], 1 }
 0x7ba   :  { %1152 = vsyncpa [#allocation7], 1 }
 0x7bb   :  { %1153 = vsyncpa [#allocation5], 1 }

</bundles_post_ra>
